<compile_context>
chip_gen: v7x
topology: tpu7x:2x2x1
jax: 0.10.0
libtpu: 0.0.40
codegen_flags: <defaults>
</compile_context>

<pallas_src>
import functools
import math

import jax
import jax.numpy as jnp
from jax.experimental import pallas as pl
from jax.experimental.pallas import tpu as pltpu


# ----------------------------------------------------------------------------
# Single fused kernel: MHA (across S, batched over L) + AttLayer2 pooling.
#   x_ref    : (L, S, E)   S = B*N news items, L tokens each (L leading)
#   wqkv_ref : (E, 3E)     fused in-projection (= in_proj_weight.T)
#   bqkv_ref : (1, 3E)
#   wout_ref : (E, E)      out-projection (= out_proj.weight.T)
#   bout_ref : (1, E)
#   attw_ref : (E, D)      AttLayer2 projection
#   attb_ref : (1, D)
#   attq_ref : (1, D)      AttLayer2 query (row layout)
#   o_ref    : (S, E)      pooled news representations
# ----------------------------------------------------------------------------
def make_fused_kernel(S, L, E, num_heads):
    dk = E // num_heads
    scale = 1.0 / math.sqrt(dk)

    def kernel(x_ref, wqkv_ref, bqkv_ref, wout_ref, bout_ref,
               attw_ref, attb_ref, attq_ref, o_ref):
        # ---- everything resident in VMEM -------------------------------
        x = x_ref[...]                          # (L, S, E)
        x2 = x.reshape(L * S, E)                # L-major token matrix (layout no-op)
        wout = wout_ref[...]                    # (E, E)

        # ---- fused QKV projection: one full-width matmul ----------------
        qkv = jnp.dot(x2, wqkv_ref[...], preferred_element_type=jnp.float32)
        qkv = qkv + bqkv_ref[...]               # (L*S, 3E)

        # ---- multi-head attention across S, batched over L --------------
        # per-head accumulate against W_out row-slices == concat-heads @ W_out
        acc = jnp.zeros((L * S, E), jnp.float32)
        for h in range(num_heads):              # static unroll, H is small
            q = qkv[:, h * dk:(h + 1) * dk].reshape(L, S, dk)
            k = qkv[:, E + h * dk:E + (h + 1) * dk].reshape(L, S, dk)
            v = qkv[:, 2 * E + h * dk:2 * E + (h + 1) * dk].reshape(L, S, dk)
            s = jnp.einsum("lqd,lkd->lqk", q * scale, k,
                           preferred_element_type=jnp.float32)        # (L,S,S)
            s = s - jnp.max(s, axis=-1, keepdims=True)
            p = jnp.exp(s)
            p = p * pl.reciprocal(jnp.sum(p, axis=-1, keepdims=True),
                                  approx=True)
            ctx = jnp.einsum("lqk,lkd->lqd", p, v,
                             preferred_element_type=jnp.float32)      # (L,S,dk)
            acc = acc + jnp.dot(ctx.reshape(L * S, dk),
                                wout[h * dk:(h + 1) * dk, :],
                                preferred_element_type=jnp.float32)
        y = acc + bout_ref[...]                 # (L*S, E); dropout = identity

        # ---- AttLayer2: additive attention over L per news item ---------
        a = jnp.tanh(jnp.dot(y, attw_ref[...],
                             preferred_element_type=jnp.float32)
                     + attb_ref[...])                                  # (L*S, D)
        sc = jnp.sum(a * attq_ref[...], axis=-1, keepdims=True)        # (L*S, 1)
        # Matches the original AttLayer2: exp without max-subtraction, +1e-8.
        e = jnp.exp(sc)
        denom = jnp.zeros((S, 1), jnp.float32)
        for l in range(L):                      # static unroll: sum over L
            denom = denom + e[l * S:(l + 1) * S, :]
        inv = pl.reciprocal(denom + 1e-8, approx=True)                 # (S, 1)
        pooled = jnp.zeros((S, E), jnp.float32)
        for l in range(L):
            w_l = e[l * S:(l + 1) * S, :] * inv                        # (S, 1)
            pooled = pooled + w_l * y[l * S:(l + 1) * S, :]
        o_ref[...] = pooled                      # one lane-dense (S, E) store

    return kernel


# ----------------------------------------------------------------------------
# Wrapper: one pallas_call, single grid step, whole problem in VMEM.
# ----------------------------------------------------------------------------
def news_encoder_forward(x, params, num_heads):
    B, N, L, E = x.shape
    S = B * N
    D = params["att_w"].shape[1]

    # (B,N,L,E) -> (B*N, L, E); MultiheadAttention(batch_first=False) treats it
    # as (seq=B*N, batch=L, embed=E), so put the attention-batch axis L leading.
    x_mha = jnp.transpose(x.reshape(S, L, E), (1, 0, 2)).astype(jnp.float32)

    kernel = make_fused_kernel(S, L, E, num_heads)
    return pl.pallas_call(
        kernel,
        out_shape=jax.ShapeDtypeStruct((S, E), jnp.float32),
        grid_spec=pltpu.PrefetchScalarGridSpec(
            num_scalar_prefetch=0,
            grid=(1,),                           # single step: no pipeline overhead
            in_specs=[
                pl.BlockSpec((L, S, E), lambda i: (0, 0, 0)),
                pl.BlockSpec((E, 3 * E), lambda i: (0, 0)),
                pl.BlockSpec((1, 3 * E), lambda i: (0, 0)),
                pl.BlockSpec((E, E), lambda i: (0, 0)),
                pl.BlockSpec((1, E), lambda i: (0, 0)),
                pl.BlockSpec((E, D), lambda i: (0, 0)),
                pl.BlockSpec((1, D), lambda i: (0, 0)),
                pl.BlockSpec((1, D), lambda i: (0, 0)),
            ],
            out_specs=pl.BlockSpec((S, E), lambda i: (0, 0)),
        ),
        compiler_params=pltpu.CompilerParams(
            dimension_semantics=("arbitrary",)),
    )(x_mha, params["w_qkv"], params["b_qkv"], params["w_out"],
      params["b_out"], params["att_w"], params["att_b"], params["att_q_row"])


# ----------------------------------------------------------------------------
# Pure-JAX reference (same math, for a correctness check)
# ----------------------------------------------------------------------------
def reference_forward(x, params, num_heads):
    B, N, L, E = x.shape
    S = B * N
    dk = E // num_heads
    scale = 1.0 / math.sqrt(dk)
    xr = jnp.transpose(x.reshape(S, L, E), (1, 0, 2))                   # (L,S,E)
    qkv = jnp.einsum("lse,ef->lsf", xr, params["w_qkv"]) + params["b_qkv"]
    y = jnp.zeros((L, S, E), jnp.float32) + params["b_out"]
    for h in range(num_heads):
        q = qkv[..., h * dk:(h + 1) * dk]
        k = qkv[..., E + h * dk:E + (h + 1) * dk]
        v = qkv[..., 2 * E + h * dk:2 * E + (h + 1) * dk]
        s = jnp.einsum("lqd,lkd->lqk", q * scale, k)
        p = jax.nn.softmax(s, axis=-1)
        y = y + jnp.einsum("lqk,lkd->lqd", p, v) @ params["w_out"][h * dk:(h + 1) * dk]
    y = jnp.transpose(y, (1, 0, 2))                                     # (S,L,E)
    a = jnp.tanh(jnp.einsum("sle,ed->sld", y, params["att_w"]) + params["att_b"])
    sc = jnp.sum(a * params["att_q_row"], axis=-1, keepdims=True)       # (S,L,1)
    w = jnp.exp(sc)
    w = w / (jnp.sum(w, axis=1, keepdims=True) + 1e-8)
    return jnp.sum(y * w, axis=1)                                       # (S,E)


# ----------------------------------------------------------------------------
# Deterministic parameter init (mirrors xavier_uniform / zeros of __init__)
# ----------------------------------------------------------------------------
def glorot_uniform(key, shape):
    fan_in, fan_out = shape[1], shape[0]
    limit = math.sqrt(6.0 / (fan_in + fan_out))
    return jax.random.uniform(key, shape, jnp.float32, -limit, limit)


def make_params(key, embed_dim, num_heads, att_hidden):
    E, D = embed_dim, att_hidden
    k1, k2, k3, k4 = jax.random.split(key, 4)

    # PyTorch-layout tensors
    in_proj_weight = glorot_uniform(k1, (3 * E, E))     # q = x @ W[:E].T
    in_proj_bias = jnp.zeros((3 * E,), jnp.float32)
    out_proj_weight = glorot_uniform(k2, (E, E))        # out = concat @ Wo.T
    out_proj_bias = jnp.zeros((E,), jnp.float32)
    att_W = glorot_uniform(k3, (E, D))
    att_b = jnp.zeros((D,), jnp.float32)
    att_q = glorot_uniform(k4, (D, 1))

    # Kernel-friendly (full-width, lane-dense) repacks — plain JAX glue.
    return dict(
        w_qkv=in_proj_weight.T,                          # (E, 3E)
        b_qkv=in_proj_bias.reshape(1, 3 * E),            # (1, 3E)
        w_out=out_proj_weight.T,                         # (E, E)
        b_out=out_proj_bias.reshape(1, E),               # (1, E)
        att_w=att_W,                                     # (E, D)
        att_b=att_b.reshape(1, D),                       # (1, D)
        att_q_row=att_q.T,                               # (1, D)
    )


if __name__ == "__main__":
    # hparams: embedded_dimension=32, head_num=4, attention_hidden_dim=16
    B, N, L, E, H, D_ATT = 2, 4, 8, 32, 4, 16

    root = jax.random.PRNGKey(0)
    kp, kx = jax.random.split(root)
    params = make_params(kp, E, H, D_ATT)
    embedded_sequences = jax.random.normal(kx, (B, N, L, E), jnp.float32)

    fwd = jax.jit(functools.partial(news_encoder_forward, num_heads=H))
    out = jax.block_until_ready(fwd(embedded_sequences, params))

    ref = reference_forward(embedded_sequences, params, H)
    err = float(jnp.max(jnp.abs(out - ref)))
    assert out.shape == (B * N, E), out.shape
    assert err < 2e-2, f"max abs err too large: {err}"

    # TODO(synk): nn.Dropout is modelled as identity (inference mode); training-mode
    # stochastic dropout is not implemented in the kernel.
    print("KERNEL_OK")
</pallas_src>

<mosaic_0001>
module attributes {stable_mosaic.version = 11 : i64} {
  func.func @kernel(%arg0: i32, %arg1: memref<8x8x32xf32, #tpu.memory_space<vmem>>, %arg2: memref<32x96xf32, #tpu.memory_space<vmem>>, %arg3: memref<1x96xf32, #tpu.memory_space<vmem>>, %arg4: memref<32x32xf32, #tpu.memory_space<vmem>>, %arg5: memref<1x32xf32, #tpu.memory_space<vmem>>, %arg6: memref<32x16xf32, #tpu.memory_space<vmem>>, %arg7: memref<1x16xf32, #tpu.memory_space<vmem>>, %arg8: memref<1x16xf32, #tpu.memory_space<vmem>>, %arg9: memref<8x32xf32, #tpu.memory_space<vmem>>) attributes {dimension_semantics = [#tpu.dimension_semantics<arbitrary>], iteration_bounds = array<i64: 1>, scalar_prefetch = 0 : i64, scratch_operands = 0 : i64, tpu.core_type = #tpu.core_type<tc>, window_params = [{pipeline_mode = #tpu.pipeline_mode<synchronous>, transform_indices = @transform_0, window_bounds = array<i64: 8, 8, 32>}, {pipeline_mode = #tpu.pipeline_mode<synchronous>, transform_indices = @transform_1, window_bounds = array<i64: 32, 96>}, {pipeline_mode = #tpu.pipeline_mode<synchronous>, transform_indices = @transform_2, window_bounds = array<i64: 1, 96>}, {pipeline_mode = #tpu.pipeline_mode<synchronous>, transform_indices = @transform_3, window_bounds = array<i64: 32, 32>}, {pipeline_mode = #tpu.pipeline_mode<synchronous>, transform_indices = @transform_4, window_bounds = array<i64: 1, 32>}, {pipeline_mode = #tpu.pipeline_mode<synchronous>, transform_indices = @transform_5, window_bounds = array<i64: 32, 16>}, {pipeline_mode = #tpu.pipeline_mode<synchronous>, transform_indices = @transform_6, window_bounds = array<i64: 1, 16>}, {pipeline_mode = #tpu.pipeline_mode<synchronous>, transform_indices = @transform_7, window_bounds = array<i64: 1, 16>}, {pipeline_mode = #tpu.pipeline_mode<synchronous>, transform_indices = @transform_8, window_bounds = array<i64: 8, 32>}]} {
    %c0 = arith.constant 0 : index
    %c0_0 = arith.constant 0 : index
    %c0_1 = arith.constant 0 : index
    %0 = vector.load %arg1[%c0, %c0_0, %c0_1] : memref<8x8x32xf32, #tpu.memory_space<vmem>>, vector<8x8x32xf32>
    %1 = vector.shape_cast %0 : vector<8x8x32xf32> to vector<64x32xf32>
    %c0_2 = arith.constant 0 : index
    %c0_3 = arith.constant 0 : index
    %2 = vector.load %arg4[%c0_2, %c0_3] : memref<32x32xf32, #tpu.memory_space<vmem>>, vector<32x32xf32>
    %c0_4 = arith.constant 0 : index
    %c0_5 = arith.constant 0 : index
    %3 = vector.load %arg2[%c0_4, %c0_5] : memref<32x96xf32, #tpu.memory_space<vmem>>, vector<32x96xf32>
    %cst = arith.constant dense<0.000000e+00> : vector<64x96xf32>
    %4 = tpu.matmul %1, %3, %cst {dimension_numbers = #tpu.dot_dimension_numbers<[1], [0], [0], [1], [0, 0, 1, 1], [], []>} : vector<64x32xf32>, vector<32x96xf32>, vector<64x96xf32> -> vector<64x96xf32>
    %c0_6 = arith.constant 0 : index
    %c0_7 = arith.constant 0 : index
    %5 = vector.load %arg3[%c0_6, %c0_7] : memref<1x96xf32, #tpu.memory_space<vmem>>, vector<1x96xf32>
    %6 = vector.broadcast %5 : vector<1x96xf32> to vector<64x96xf32>
    %7 = arith.addf %4, %6 : vector<64x96xf32>
    %cst_8 = arith.constant 0.000000e+00 : f32
    %8 = vector.broadcast %cst_8 : f32 to vector<64x32xf32>
    %9 = vector.extract_strided_slice %7 {offsets = [0, 0], sizes = [64, 8], strides = [1, 1]} : vector<64x96xf32> to vector<64x8xf32>
    %10 = vector.shape_cast %9 : vector<64x8xf32> to vector<8x8x8xf32>
    %11 = vector.extract_strided_slice %7 {offsets = [0, 32], sizes = [64, 8], strides = [1, 1]} : vector<64x96xf32> to vector<64x8xf32>
    %12 = vector.shape_cast %11 : vector<64x8xf32> to vector<8x8x8xf32>
    %13 = vector.extract_strided_slice %7 {offsets = [0, 64], sizes = [64, 8], strides = [1, 1]} : vector<64x96xf32> to vector<64x8xf32>
    %14 = vector.shape_cast %13 : vector<64x8xf32> to vector<8x8x8xf32>
    %cst_9 = arith.constant 0.353553385 : f32
    %15 = vector.broadcast %cst_9 : f32 to vector<8x8x8xf32>
    %16 = arith.mulf %10, %15 : vector<8x8x8xf32>
    "tpu.trace_start"() <{level = 10 : i32, message = "lqd,lkd->lqk"}> : () -> ()
    %cst_10 = arith.constant dense<0.000000e+00> : vector<8x8x8xf32>
    %17 = tpu.matmul %16, %12, %cst_10 {dimension_numbers = #tpu.dot_dimension_numbers<[2], [2], [1], [1], [0, 0, 0, 1, 1, 1], [0], [0]>} : vector<8x8x8xf32>, vector<8x8x8xf32>, vector<8x8x8xf32> -> vector<8x8x8xf32>
    "tpu.trace_stop"() : () -> ()
    %cst_11 = arith.constant dense<0xFF800000> : vector<8x8xf32>
    %18 = vector.multi_reduction <maximumf>, %17, %cst_11 [2] : vector<8x8x8xf32> to vector<8x8xf32>
    %19 = vector.shape_cast %18 : vector<8x8xf32> to vector<8x8x1xf32>
    %20 = vector.broadcast %19 : vector<8x8x1xf32> to vector<8x8x8xf32>
    %21 = arith.subf %17, %20 : vector<8x8x8xf32>
    %22 = math.exp %21 : vector<8x8x8xf32>
    %cst_12 = arith.constant dense<0.000000e+00> : vector<8x8xf32>
    %23 = vector.multi_reduction <add>, %22, %cst_12 [2] : vector<8x8x8xf32> to vector<8x8xf32>
    %24 = vector.shape_cast %23 : vector<8x8xf32> to vector<8x8x1xf32>
    %25 = tpu.reciprocal %24 {approx = true} : vector<8x8x1xf32> -> vector<8x8x1xf32>
    %26 = vector.broadcast %25 : vector<8x8x1xf32> to vector<8x8x8xf32>
    %27 = arith.mulf %22, %26 : vector<8x8x8xf32>
    "tpu.trace_start"() <{level = 10 : i32, message = "lqk,lkd->lqd"}> : () -> ()
    %cst_13 = arith.constant dense<0.000000e+00> : vector<8x8x8xf32>
    %28 = tpu.matmul %27, %14, %cst_13 {dimension_numbers = #tpu.dot_dimension_numbers<[2], [1], [1], [2], [0, 0, 0, 1, 1, 2], [0], [0]>} : vector<8x8x8xf32>, vector<8x8x8xf32>, vector<8x8x8xf32> -> vector<8x8x8xf32>
    "tpu.trace_stop"() : () -> ()
    %29 = vector.shape_cast %28 : vector<8x8x8xf32> to vector<64x8xf32>
    %30 = vector.extract_strided_slice %2 {offsets = [0, 0], sizes = [8, 32], strides = [1, 1]} : vector<32x32xf32> to vector<8x32xf32>
    %cst_14 = arith.constant dense<0.000000e+00> : vector<64x32xf32>
    %31 = tpu.matmul %29, %30, %cst_14 {dimension_numbers = #tpu.dot_dimension_numbers<[1], [0], [0], [1], [0, 0, 1, 1], [], []>} : vector<64x8xf32>, vector<8x32xf32>, vector<64x32xf32> -> vector<64x32xf32>
    %32 = arith.addf %8, %31 : vector<64x32xf32>
    %33 = vector.extract_strided_slice %7 {offsets = [0, 8], sizes = [64, 8], strides = [1, 1]} : vector<64x96xf32> to vector<64x8xf32>
    %34 = vector.shape_cast %33 : vector<64x8xf32> to vector<8x8x8xf32>
    %35 = vector.extract_strided_slice %7 {offsets = [0, 40], sizes = [64, 8], strides = [1, 1]} : vector<64x96xf32> to vector<64x8xf32>
    %36 = vector.shape_cast %35 : vector<64x8xf32> to vector<8x8x8xf32>
    %37 = vector.extract_strided_slice %7 {offsets = [0, 72], sizes = [64, 8], strides = [1, 1]} : vector<64x96xf32> to vector<64x8xf32>
    %38 = vector.shape_cast %37 : vector<64x8xf32> to vector<8x8x8xf32>
    %cst_15 = arith.constant 0.353553385 : f32
    %39 = vector.broadcast %cst_15 : f32 to vector<8x8x8xf32>
    %40 = arith.mulf %34, %39 : vector<8x8x8xf32>
    "tpu.trace_start"() <{level = 10 : i32, message = "lqd,lkd->lqk"}> : () -> ()
    %cst_16 = arith.constant dense<0.000000e+00> : vector<8x8x8xf32>
    %41 = tpu.matmul %40, %36, %cst_16 {dimension_numbers = #tpu.dot_dimension_numbers<[2], [2], [1], [1], [0, 0, 0, 1, 1, 1], [0], [0]>} : vector<8x8x8xf32>, vector<8x8x8xf32>, vector<8x8x8xf32> -> vector<8x8x8xf32>
    "tpu.trace_stop"() : () -> ()
    %cst_17 = arith.constant dense<0xFF800000> : vector<8x8xf32>
    %42 = vector.multi_reduction <maximumf>, %41, %cst_17 [2] : vector<8x8x8xf32> to vector<8x8xf32>
    %43 = vector.shape_cast %42 : vector<8x8xf32> to vector<8x8x1xf32>
    %44 = vector.broadcast %43 : vector<8x8x1xf32> to vector<8x8x8xf32>
    %45 = arith.subf %41, %44 : vector<8x8x8xf32>
    %46 = math.exp %45 : vector<8x8x8xf32>
    %cst_18 = arith.constant dense<0.000000e+00> : vector<8x8xf32>
    %47 = vector.multi_reduction <add>, %46, %cst_18 [2] : vector<8x8x8xf32> to vector<8x8xf32>
    %48 = vector.shape_cast %47 : vector<8x8xf32> to vector<8x8x1xf32>
    %49 = tpu.reciprocal %48 {approx = true} : vector<8x8x1xf32> -> vector<8x8x1xf32>
    %50 = vector.broadcast %49 : vector<8x8x1xf32> to vector<8x8x8xf32>
    %51 = arith.mulf %46, %50 : vector<8x8x8xf32>
    "tpu.trace_start"() <{level = 10 : i32, message = "lqk,lkd->lqd"}> : () -> ()
    %cst_19 = arith.constant dense<0.000000e+00> : vector<8x8x8xf32>
    %52 = tpu.matmul %51, %38, %cst_19 {dimension_numbers = #tpu.dot_dimension_numbers<[2], [1], [1], [2], [0, 0, 0, 1, 1, 2], [0], [0]>} : vector<8x8x8xf32>, vector<8x8x8xf32>, vector<8x8x8xf32> -> vector<8x8x8xf32>
    "tpu.trace_stop"() : () -> ()
    %53 = vector.shape_cast %52 : vector<8x8x8xf32> to vector<64x8xf32>
    %54 = vector.extract_strided_slice %2 {offsets = [8, 0], sizes = [8, 32], strides = [1, 1]} : vector<32x32xf32> to vector<8x32xf32>
    %cst_20 = arith.constant dense<0.000000e+00> : vector<64x32xf32>
    %55 = tpu.matmul %53, %54, %cst_20 {dimension_numbers = #tpu.dot_dimension_numbers<[1], [0], [0], [1], [0, 0, 1, 1], [], []>} : vector<64x8xf32>, vector<8x32xf32>, vector<64x32xf32> -> vector<64x32xf32>
    %56 = arith.addf %32, %55 : vector<64x32xf32>
    %57 = vector.extract_strided_slice %7 {offsets = [0, 16], sizes = [64, 8], strides = [1, 1]} : vector<64x96xf32> to vector<64x8xf32>
    %58 = vector.shape_cast %57 : vector<64x8xf32> to vector<8x8x8xf32>
    %59 = vector.extract_strided_slice %7 {offsets = [0, 48], sizes = [64, 8], strides = [1, 1]} : vector<64x96xf32> to vector<64x8xf32>
    %60 = vector.shape_cast %59 : vector<64x8xf32> to vector<8x8x8xf32>
    %61 = vector.extract_strided_slice %7 {offsets = [0, 80], sizes = [64, 8], strides = [1, 1]} : vector<64x96xf32> to vector<64x8xf32>
    %62 = vector.shape_cast %61 : vector<64x8xf32> to vector<8x8x8xf32>
    %cst_21 = arith.constant 0.353553385 : f32
    %63 = vector.broadcast %cst_21 : f32 to vector<8x8x8xf32>
    %64 = arith.mulf %58, %63 : vector<8x8x8xf32>
    "tpu.trace_start"() <{level = 10 : i32, message = "lqd,lkd->lqk"}> : () -> ()
    %cst_22 = arith.constant dense<0.000000e+00> : vector<8x8x8xf32>
    %65 = tpu.matmul %64, %60, %cst_22 {dimension_numbers = #tpu.dot_dimension_numbers<[2], [2], [1], [1], [0, 0, 0, 1, 1, 1], [0], [0]>} : vector<8x8x8xf32>, vector<8x8x8xf32>, vector<8x8x8xf32> -> vector<8x8x8xf32>
    "tpu.trace_stop"() : () -> ()
    %cst_23 = arith.constant dense<0xFF800000> : vector<8x8xf32>
    %66 = vector.multi_reduction <maximumf>, %65, %cst_23 [2] : vector<8x8x8xf32> to vector<8x8xf32>
    %67 = vector.shape_cast %66 : vector<8x8xf32> to vector<8x8x1xf32>
    %68 = vector.broadcast %67 : vector<8x8x1xf32> to vector<8x8x8xf32>
    %69 = arith.subf %65, %68 : vector<8x8x8xf32>
    %70 = math.exp %69 : vector<8x8x8xf32>
    %cst_24 = arith.constant dense<0.000000e+00> : vector<8x8xf32>
    %71 = vector.multi_reduction <add>, %70, %cst_24 [2] : vector<8x8x8xf32> to vector<8x8xf32>
    %72 = vector.shape_cast %71 : vector<8x8xf32> to vector<8x8x1xf32>
    %73 = tpu.reciprocal %72 {approx = true} : vector<8x8x1xf32> -> vector<8x8x1xf32>
    %74 = vector.broadcast %73 : vector<8x8x1xf32> to vector<8x8x8xf32>
    %75 = arith.mulf %70, %74 : vector<8x8x8xf32>
    "tpu.trace_start"() <{level = 10 : i32, message = "lqk,lkd->lqd"}> : () -> ()
    %cst_25 = arith.constant dense<0.000000e+00> : vector<8x8x8xf32>
    %76 = tpu.matmul %75, %62, %cst_25 {dimension_numbers = #tpu.dot_dimension_numbers<[2], [1], [1], [2], [0, 0, 0, 1, 1, 2], [0], [0]>} : vector<8x8x8xf32>, vector<8x8x8xf32>, vector<8x8x8xf32> -> vector<8x8x8xf32>
    "tpu.trace_stop"() : () -> ()
    %77 = vector.shape_cast %76 : vector<8x8x8xf32> to vector<64x8xf32>
    %78 = vector.extract_strided_slice %2 {offsets = [16, 0], sizes = [8, 32], strides = [1, 1]} : vector<32x32xf32> to vector<8x32xf32>
    %cst_26 = arith.constant dense<0.000000e+00> : vector<64x32xf32>
    %79 = tpu.matmul %77, %78, %cst_26 {dimension_numbers = #tpu.dot_dimension_numbers<[1], [0], [0], [1], [0, 0, 1, 1], [], []>} : vector<64x8xf32>, vector<8x32xf32>, vector<64x32xf32> -> vector<64x32xf32>
    %80 = arith.addf %56, %79 : vector<64x32xf32>
    %81 = vector.extract_strided_slice %7 {offsets = [0, 24], sizes = [64, 8], strides = [1, 1]} : vector<64x96xf32> to vector<64x8xf32>
    %82 = vector.shape_cast %81 : vector<64x8xf32> to vector<8x8x8xf32>
    %83 = vector.extract_strided_slice %7 {offsets = [0, 56], sizes = [64, 8], strides = [1, 1]} : vector<64x96xf32> to vector<64x8xf32>
    %84 = vector.shape_cast %83 : vector<64x8xf32> to vector<8x8x8xf32>
    %85 = vector.extract_strided_slice %7 {offsets = [0, 88], sizes = [64, 8], strides = [1, 1]} : vector<64x96xf32> to vector<64x8xf32>
    %86 = vector.shape_cast %85 : vector<64x8xf32> to vector<8x8x8xf32>
    %cst_27 = arith.constant 0.353553385 : f32
    %87 = vector.broadcast %cst_27 : f32 to vector<8x8x8xf32>
    %88 = arith.mulf %82, %87 : vector<8x8x8xf32>
    "tpu.trace_start"() <{level = 10 : i32, message = "lqd,lkd->lqk"}> : () -> ()
    %cst_28 = arith.constant dense<0.000000e+00> : vector<8x8x8xf32>
    %89 = tpu.matmul %88, %84, %cst_28 {dimension_numbers = #tpu.dot_dimension_numbers<[2], [2], [1], [1], [0, 0, 0, 1, 1, 1], [0], [0]>} : vector<8x8x8xf32>, vector<8x8x8xf32>, vector<8x8x8xf32> -> vector<8x8x8xf32>
    "tpu.trace_stop"() : () -> ()
    %cst_29 = arith.constant dense<0xFF800000> : vector<8x8xf32>
    %90 = vector.multi_reduction <maximumf>, %89, %cst_29 [2] : vector<8x8x8xf32> to vector<8x8xf32>
    %91 = vector.shape_cast %90 : vector<8x8xf32> to vector<8x8x1xf32>
    %92 = vector.broadcast %91 : vector<8x8x1xf32> to vector<8x8x8xf32>
    %93 = arith.subf %89, %92 : vector<8x8x8xf32>
    %94 = math.exp %93 : vector<8x8x8xf32>
    %cst_30 = arith.constant dense<0.000000e+00> : vector<8x8xf32>
    %95 = vector.multi_reduction <add>, %94, %cst_30 [2] : vector<8x8x8xf32> to vector<8x8xf32>
    %96 = vector.shape_cast %95 : vector<8x8xf32> to vector<8x8x1xf32>
    %97 = tpu.reciprocal %96 {approx = true} : vector<8x8x1xf32> -> vector<8x8x1xf32>
    %98 = vector.broadcast %97 : vector<8x8x1xf32> to vector<8x8x8xf32>
    %99 = arith.mulf %94, %98 : vector<8x8x8xf32>
    "tpu.trace_start"() <{level = 10 : i32, message = "lqk,lkd->lqd"}> : () -> ()
    %cst_31 = arith.constant dense<0.000000e+00> : vector<8x8x8xf32>
    %100 = tpu.matmul %99, %86, %cst_31 {dimension_numbers = #tpu.dot_dimension_numbers<[2], [1], [1], [2], [0, 0, 0, 1, 1, 2], [0], [0]>} : vector<8x8x8xf32>, vector<8x8x8xf32>, vector<8x8x8xf32> -> vector<8x8x8xf32>
    "tpu.trace_stop"() : () -> ()
    %101 = vector.shape_cast %100 : vector<8x8x8xf32> to vector<64x8xf32>
    %102 = vector.extract_strided_slice %2 {offsets = [24, 0], sizes = [8, 32], strides = [1, 1]} : vector<32x32xf32> to vector<8x32xf32>
    %cst_32 = arith.constant dense<0.000000e+00> : vector<64x32xf32>
    %103 = tpu.matmul %101, %102, %cst_32 {dimension_numbers = #tpu.dot_dimension_numbers<[1], [0], [0], [1], [0, 0, 1, 1], [], []>} : vector<64x8xf32>, vector<8x32xf32>, vector<64x32xf32> -> vector<64x32xf32>
    %104 = arith.addf %80, %103 : vector<64x32xf32>
    %c0_33 = arith.constant 0 : index
    %c0_34 = arith.constant 0 : index
    %105 = vector.load %arg5[%c0_33, %c0_34] : memref<1x32xf32, #tpu.memory_space<vmem>>, vector<1x32xf32>
    %106 = vector.broadcast %105 : vector<1x32xf32> to vector<64x32xf32>
    %107 = arith.addf %104, %106 : vector<64x32xf32>
    %c0_35 = arith.constant 0 : index
    %c0_36 = arith.constant 0 : index
    %108 = vector.load %arg6[%c0_35, %c0_36] : memref<32x16xf32, #tpu.memory_space<vmem>>, vector<32x16xf32>
    %cst_37 = arith.constant dense<0.000000e+00> : vector<64x16xf32>
    %109 = tpu.matmul %107, %108, %cst_37 {dimension_numbers = #tpu.dot_dimension_numbers<[1], [0], [0], [1], [0, 0, 1, 1], [], []>} : vector<64x32xf32>, vector<32x16xf32>, vector<64x16xf32> -> vector<64x16xf32>
    %c0_38 = arith.constant 0 : index
    %c0_39 = arith.constant 0 : index
    %110 = vector.load %arg7[%c0_38, %c0_39] : memref<1x16xf32, #tpu.memory_space<vmem>>, vector<1x16xf32>
    %111 = vector.broadcast %110 : vector<1x16xf32> to vector<64x16xf32>
    %112 = arith.addf %109, %111 : vector<64x16xf32>
    %113 = math.tanh %112 : vector<64x16xf32>
    %c0_40 = arith.constant 0 : index
    %c0_41 = arith.constant 0 : index
    %114 = vector.load %arg8[%c0_40, %c0_41] : memref<1x16xf32, #tpu.memory_space<vmem>>, vector<1x16xf32>
    %115 = vector.broadcast %114 : vector<1x16xf32> to vector<64x16xf32>
    %116 = arith.mulf %113, %115 : vector<64x16xf32>
    %cst_42 = arith.constant dense<0.000000e+00> : vector<64xf32>
    %117 = vector.multi_reduction <add>, %116, %cst_42 [1] : vector<64x16xf32> to vector<64xf32>
    %118 = vector.shape_cast %117 : vector<64xf32> to vector<64x1xf32>
    %119 = math.exp %118 : vector<64x1xf32>
    %cst_43 = arith.constant 0.000000e+00 : f32
    %120 = vector.broadcast %cst_43 : f32 to vector<8x1xf32>
    %121 = vector.extract_strided_slice %119 {offsets = [0, 0], sizes = [8, 1], strides = [1, 1]} : vector<64x1xf32> to vector<8x1xf32>
    %122 = arith.addf %120, %121 : vector<8x1xf32>
    %123 = vector.extract_strided_slice %119 {offsets = [8, 0], sizes = [8, 1], strides = [1, 1]} : vector<64x1xf32> to vector<8x1xf32>
    %124 = arith.addf %122, %123 : vector<8x1xf32>
    %125 = vector.extract_strided_slice %119 {offsets = [16, 0], sizes = [8, 1], strides = [1, 1]} : vector<64x1xf32> to vector<8x1xf32>
    %126 = arith.addf %124, %125 : vector<8x1xf32>
    %127 = vector.extract_strided_slice %119 {offsets = [24, 0], sizes = [8, 1], strides = [1, 1]} : vector<64x1xf32> to vector<8x1xf32>
    %128 = arith.addf %126, %127 : vector<8x1xf32>
    %129 = vector.extract_strided_slice %119 {offsets = [32, 0], sizes = [8, 1], strides = [1, 1]} : vector<64x1xf32> to vector<8x1xf32>
    %130 = arith.addf %128, %129 : vector<8x1xf32>
    %131 = vector.extract_strided_slice %119 {offsets = [40, 0], sizes = [8, 1], strides = [1, 1]} : vector<64x1xf32> to vector<8x1xf32>
    %132 = arith.addf %130, %131 : vector<8x1xf32>
    %133 = vector.extract_strided_slice %119 {offsets = [48, 0], sizes = [8, 1], strides = [1, 1]} : vector<64x1xf32> to vector<8x1xf32>
    %134 = arith.addf %132, %133 : vector<8x1xf32>
    %135 = vector.extract_strided_slice %119 {offsets = [56, 0], sizes = [8, 1], strides = [1, 1]} : vector<64x1xf32> to vector<8x1xf32>
    %136 = arith.addf %134, %135 : vector<8x1xf32>
    %cst_44 = arith.constant 9.99999993E-9 : f32
    %137 = vector.broadcast %cst_44 : f32 to vector<8x1xf32>
    %138 = arith.addf %136, %137 : vector<8x1xf32>
    %139 = tpu.reciprocal %138 {approx = true} : vector<8x1xf32> -> vector<8x1xf32>
    %cst_45 = arith.constant 0.000000e+00 : f32
    %140 = vector.broadcast %cst_45 : f32 to vector<8x32xf32>
    %141 = vector.extract_strided_slice %119 {offsets = [0, 0], sizes = [8, 1], strides = [1, 1]} : vector<64x1xf32> to vector<8x1xf32>
    %142 = arith.mulf %141, %139 : vector<8x1xf32>
    %143 = vector.extract_strided_slice %107 {offsets = [0, 0], sizes = [8, 32], strides = [1, 1]} : vector<64x32xf32> to vector<8x32xf32>
    %144 = vector.broadcast %142 : vector<8x1xf32> to vector<8x32xf32>
    %145 = arith.mulf %144, %143 : vector<8x32xf32>
    %146 = arith.addf %140, %145 : vector<8x32xf32>
    %147 = vector.extract_strided_slice %119 {offsets = [8, 0], sizes = [8, 1], strides = [1, 1]} : vector<64x1xf32> to vector<8x1xf32>
    %148 = arith.mulf %147, %139 : vector<8x1xf32>
    %149 = vector.extract_strided_slice %107 {offsets = [8, 0], sizes = [8, 32], strides = [1, 1]} : vector<64x32xf32> to vector<8x32xf32>
    %150 = vector.broadcast %148 : vector<8x1xf32> to vector<8x32xf32>
    %151 = arith.mulf %150, %149 : vector<8x32xf32>
    %152 = arith.addf %146, %151 : vector<8x32xf32>
    %153 = vector.extract_strided_slice %119 {offsets = [16, 0], sizes = [8, 1], strides = [1, 1]} : vector<64x1xf32> to vector<8x1xf32>
    %154 = arith.mulf %153, %139 : vector<8x1xf32>
    %155 = vector.extract_strided_slice %107 {offsets = [16, 0], sizes = [8, 32], strides = [1, 1]} : vector<64x32xf32> to vector<8x32xf32>
    %156 = vector.broadcast %154 : vector<8x1xf32> to vector<8x32xf32>
    %157 = arith.mulf %156, %155 : vector<8x32xf32>
    %158 = arith.addf %152, %157 : vector<8x32xf32>
    %159 = vector.extract_strided_slice %119 {offsets = [24, 0], sizes = [8, 1], strides = [1, 1]} : vector<64x1xf32> to vector<8x1xf32>
    %160 = arith.mulf %159, %139 : vector<8x1xf32>
    %161 = vector.extract_strided_slice %107 {offsets = [24, 0], sizes = [8, 32], strides = [1, 1]} : vector<64x32xf32> to vector<8x32xf32>
    %162 = vector.broadcast %160 : vector<8x1xf32> to vector<8x32xf32>
    %163 = arith.mulf %162, %161 : vector<8x32xf32>
    %164 = arith.addf %158, %163 : vector<8x32xf32>
    %165 = vector.extract_strided_slice %119 {offsets = [32, 0], sizes = [8, 1], strides = [1, 1]} : vector<64x1xf32> to vector<8x1xf32>
    %166 = arith.mulf %165, %139 : vector<8x1xf32>
    %167 = vector.extract_strided_slice %107 {offsets = [32, 0], sizes = [8, 32], strides = [1, 1]} : vector<64x32xf32> to vector<8x32xf32>
    %168 = vector.broadcast %166 : vector<8x1xf32> to vector<8x32xf32>
    %169 = arith.mulf %168, %167 : vector<8x32xf32>
    %170 = arith.addf %164, %169 : vector<8x32xf32>
    %171 = vector.extract_strided_slice %119 {offsets = [40, 0], sizes = [8, 1], strides = [1, 1]} : vector<64x1xf32> to vector<8x1xf32>
    %172 = arith.mulf %171, %139 : vector<8x1xf32>
    %173 = vector.extract_strided_slice %107 {offsets = [40, 0], sizes = [8, 32], strides = [1, 1]} : vector<64x32xf32> to vector<8x32xf32>
    %174 = vector.broadcast %172 : vector<8x1xf32> to vector<8x32xf32>
    %175 = arith.mulf %174, %173 : vector<8x32xf32>
    %176 = arith.addf %170, %175 : vector<8x32xf32>
    %177 = vector.extract_strided_slice %119 {offsets = [48, 0], sizes = [8, 1], strides = [1, 1]} : vector<64x1xf32> to vector<8x1xf32>
    %178 = arith.mulf %177, %139 : vector<8x1xf32>
    %179 = vector.extract_strided_slice %107 {offsets = [48, 0], sizes = [8, 32], strides = [1, 1]} : vector<64x32xf32> to vector<8x32xf32>
    %180 = vector.broadcast %178 : vector<8x1xf32> to vector<8x32xf32>
    %181 = arith.mulf %180, %179 : vector<8x32xf32>
    %182 = arith.addf %176, %181 : vector<8x32xf32>
    %183 = vector.extract_strided_slice %119 {offsets = [56, 0], sizes = [8, 1], strides = [1, 1]} : vector<64x1xf32> to vector<8x1xf32>
    %184 = arith.mulf %183, %139 : vector<8x1xf32>
    %185 = vector.extract_strided_slice %107 {offsets = [56, 0], sizes = [8, 32], strides = [1, 1]} : vector<64x32xf32> to vector<8x32xf32>
    %186 = vector.broadcast %184 : vector<8x1xf32> to vector<8x32xf32>
    %187 = arith.mulf %186, %185 : vector<8x32xf32>
    %188 = arith.addf %182, %187 : vector<8x32xf32>
    %c0_46 = arith.constant 0 : index
    %c0_47 = arith.constant 0 : index
    %189 = vector.load %arg9[%c0_46, %c0_47] : memref<8x32xf32, #tpu.memory_space<vmem>>, vector<8x32xf32>
    tpu.vector_store %arg9[%c0_46, %c0_47], %188 {strides = array<i32>} : memref<8x32xf32, #tpu.memory_space<vmem>>, vector<8x32xf32>,
    return
  }
  func.func @transform_0(%arg0: i32) -> (i32, i32, i32) {
    %c0_i32 = arith.constant 0 : i32
    %c0_i32_0 = arith.constant 0 : i32
    %c0_i32_1 = arith.constant 0 : i32
    %c0_i32_2 = arith.constant 0 : i32
    return %c0_i32, %c0_i32_0, %c0_i32_1 : i32, i32, i32
  }
  func.func @transform_1(%arg0: i32) -> (i32, i32) {
    %c0_i32 = arith.constant 0 : i32
    %c0_i32_0 = arith.constant 0 : i32
    %c0_i32_1 = arith.constant 0 : i32
    return %c0_i32, %c0_i32_0 : i32, i32
  }
  func.func @transform_2(%arg0: i32) -> (i32, i32) {
    %c0_i32 = arith.constant 0 : i32
    %c0_i32_0 = arith.constant 0 : i32
    %c0_i32_1 = arith.constant 0 : i32
    return %c0_i32, %c0_i32_0 : i32, i32
  }
  func.func @transform_3(%arg0: i32) -> (i32, i32) {
    %c0_i32 = arith.constant 0 : i32
    %c0_i32_0 = arith.constant 0 : i32
    %c0_i32_1 = arith.constant 0 : i32
    return %c0_i32, %c0_i32_0 : i32, i32
  }
  func.func @transform_4(%arg0: i32) -> (i32, i32) {
    %c0_i32 = arith.constant 0 : i32
    %c0_i32_0 = arith.constant 0 : i32
    %c0_i32_1 = arith.constant 0 : i32
    return %c0_i32, %c0_i32_0 : i32, i32
  }
  func.func @transform_5(%arg0: i32) -> (i32, i32) {
    %c0_i32 = arith.constant 0 : i32
    %c0_i32_0 = arith.constant 0 : i32
    %c0_i32_1 = arith.constant 0 : i32
    return %c0_i32, %c0_i32_0 : i32, i32
  }
  func.func @transform_6(%arg0: i32) -> (i32, i32) {
    %c0_i32 = arith.constant 0 : i32
    %c0_i32_0 = arith.constant 0 : i32
    %c0_i32_1 = arith.constant 0 : i32
    return %c0_i32, %c0_i32_0 : i32, i32
  }
  func.func @transform_7(%arg0: i32) -> (i32, i32) {
    %c0_i32 = arith.constant 0 : i32
    %c0_i32_0 = arith.constant 0 : i32
    %c0_i32_1 = arith.constant 0 : i32
    return %c0_i32, %c0_i32_0 : i32, i32
  }
  func.func @transform_8(%arg0: i32) -> (i32, i32) {
    %c0_i32 = arith.constant 0 : i32
    %c0_i32_0 = arith.constant 0 : i32
    %c0_i32_1 = arith.constant 0 : i32
    return %c0_i32, %c0_i32_0 : i32, i32
  }
}

</mosaic_0001>

<bundles_post_ra>
// kernel: news_encoder_forward.1
= control target key start
LH: loop header
LB: loop body
LE: loop exit
PB: predicated region body
PF: predicated region fallthrough
CT: control target
= control target key end

     0   :  { %vm53_vm0 = vcmask 261120   ;;  %s8228_s0 = inlined_call_operand.vmem [shape: f32[8,8,32], index: 0, kind: input, shape index: {}]   ;;  %s8229_s1 = inlined_call_operand.vmem [shape: f32[32,96], index: 1, kind: input, shape index: {}]   ;;  %s8230_s2 = inlined_call_operand.vmem [shape: f32[1,96], index: 2, kind: input, shape index: {}]   ;;  %s8231_s3 = inlined_call_operand.vmem [shape: f32[32,32], index: 3, kind: input, shape index: {}]   ;;  %s8232_s4 = inlined_call_operand.vmem [shape: f32[1,32], index: 4, kind: input, shape index: {}]   ;;  %s8233_s5 = inlined_call_operand.vmem [shape: f32[32,16], index: 5, kind: input, shape index: {}]   ;;  %s8234_s6 = inlined_call_operand.vmem [shape: f32[1,16], index: 6, kind: input, shape index: {}]   ;;  %s8235_s7 = inlined_call_operand.vmem [shape: f32[1,16], index: 7, kind: input, shape index: {}]   ;;  %s8236_s8 = inlined_call_operand.hbm [shape: f32[8,32], index: 8, kind: output, shape index: {}]  }
   0x1   :  { %v42_v0 = vld [vmem:[%s8229_s1] sm:$0xff]  ;;  %v43_v1 = vld [vmem:[%s8229_s1 + $0x8] sm:$0xff]  ;;  %v44_v2 = vld [vmem:[%s8229_s1 + $0x10] sm:$0xff] }
   0x2   :  { %v7024_v3 = vpack.c.bf16 %v43_v1, %v42_v0  ;;  %v45_v4 = vld [vmem:[%s8229_s1 + $0x18] sm:$0xff]  ;;  %v30_v5 = vld [vmem:[%s8228_s0] sm:$0xff] }
   0x3   :  { %v7028_v6 = vpack.c.bf16 %v45_v4, %v44_v2  ;;  %6616 = vmatprep.mubr.msk.f32.mxu0 %vm53_vm0, %v30_v5 }
   0x4   :  { %7025 = vmatprep.subr.bf16.mxu0 %v7024_v3 }
   0x5   :  { %7027 = vmatpush3.bf16.msra.mxu0 %v7024_v3 }
   0x6   :  { %13 = vsyncpa [#allocation3], 0  ;;  %7029 = vmatprep.subr.bf16.mxu0 %v7028_v6  ;;  %v31_v7 = vld [vmem:[%s8228_s0 + $0x8] sm:$0xff]  ;;  %v32_v8 = vld [vmem:[%s8228_s0 + $0x10] sm:$0xff]  ;;  %v7264_v14 = vmov 0.0   ;;  %vm7265_vm1 = vmmov 0  }
   0x7   :  { %v33_v9 = vld [vmem:[%s8228_s0 + $0x18] sm:$0xff]  ;;  %v34_v10 = vld [vmem:[%s8228_s0 + $0x20] sm:$0xff]  ;;  %v35_v11 = vld [vmem:[%s8228_s0 + $0x28] sm:$0xff]  ;;  %6628 = vmatprep.subr.mxu1 %v7264_v14  ;;  %6630 = vmatprep.mubr.msk.f32.mxu1 %vm7265_vm1, %v7264_v14  ;;  %vm194_vm2 = vcmask 64512   ;;  %s7268_s30 = smov 88   ;;  %s7269_s9 = smov 120  }
   0x8   :  { %v36_v12 = vld [vmem:[%s8228_s0 + $0x30] sm:$0xff]  ;;  %v37_v13 = vld [vmem:[%s8228_s0 + $0x38] sm:$0xff]  ;;  %v6272_v15 = vld [vmem:[%s8230_s2] ss:$0 sm:$0xff]  ;;  %s7266_s0 = smov 96   ;;  %s7267_s2 = smov 64  }
   0x9   :  { %7031 = vmatpush3.bf16.msra.mxu0 %v7028_v6  ;;  %s7270_s10 = smov 56   ;;  %s7271_s11 = smov 80   ;;  %vm6182_vm3 = vcmask 130048  }
   0xa   :  { %6663 = vmatprep.subr.mxu0 %v7264_v14  ;;  %s7272_s12 = smov 112   ;;  %s7273_s13 = smov 48  }
   0xb   :  { %s7274_s18 = smov 104   ;;  %s7275_s1 = smov 72  }
   0xc   :  { %6617 = vmatmul.mubr.msk.f32.vlgmr.msra.gmra.mrb[0].mxu0 %vm53_vm0, %v31_v7  ;;  %s7276_s21 = smov 40  }
   0xd   :  { %6619 = vmatprep.mubr.msk.f32.mxu0 %vm53_vm0, %v32_v8 }
  0x10   :  { %6620 = vmatmul.mubr.msk.f32.gmra.mrb[2].mxu0 %vm53_vm0, %v33_v9 }
  0x11   :  { %6622 = vmatprep.mubr.msk.f32.mxu0 %vm53_vm0, %v34_v10 }
  0x14   :  { %6623 = vmatmul.mubr.msk.f32.gmra.mrb[4].mxu0 %vm53_vm0, %v35_v11 }
  0x15   :  { %6625 = vmatprep.mubr.msk.f32.mxu0 %vm53_vm0, %v36_v12 }
  0x18   :  { %6626 = vmatmul.mubr.msk.f32.gmra.mrb[6].mxu0 %vm53_vm0, %v37_v13 }
  0x19   :  { %6665 = vmatprep.mubr.msk.f32.mxu0 %vm7265_vm1, %v7264_v14 }
  0xdf   :  { %v6618_v16 = vpop.f32.mrb[0].mxu0 }
  0xe0   :  { %v144_v17 = vpop.f32.mrb[1].mxu0  ;;  %v7379_v21 = vadd.f32 %v6618_v16, %v6272_v15 }
  0xe1   :  { %v7376_v18 = vadd.f32 %v6272_v15, %v144_v17 }
  0xe2   :  { %v7411_v36 = vmul.f32 0.35355338, %v7379_v21 }
  0xe3   :  { %192 = vrot.lane.b32.xlu0 %v7376_v18, %s7266_s0  ;;  %v6621_v19 = vpop.f32.mrb[2].mxu0  ;;  %v7403_v33 = vmul.f32 0.35355338, %v7376_v18 }
  0xe4   :  { %v154_v20 = vpop.f32.mrb[3].mxu0  ;;  %v7383_v23 = vadd.f32 %v6621_v19, %v6272_v15 }
  0xe5   :  { %v7381_v22 = vadd.f32 %v6272_v15, %v154_v20 }
  0xe6   :  { %v7430_v41 = vmul.f32 0.35355338, %v7383_v23 }
  0xe7   :  { %v6624_v24 = vpop.f32.mrb[4].mxu0  ;;  %271 = vrot.lane.b32.xlu0 %v7379_v21, %s7266_s0  ;;  %349 = vrot.lane.b32.xlu1 %v7381_v22, %s7266_s0  ;;  %v7420_v39 = vmul.f32 0.35355338, %v7381_v22 }
  0xe8   :  { %v164_v25 = vpop.f32.mrb[5].mxu0  ;;  %v7389_v27 = vadd.f32 %v6624_v24, %v6272_v15 }
  0xe9   :  { %v7387_v26 = vadd.f32 %v6272_v15, %v164_v25 }
  0xea   :  { %v7456_v46 = vmul.f32 0.35355338, %v7389_v27 }
  0xeb   :  { %505 = vrot.lane.b32.xlu0 %v7387_v26, %s7266_s0  ;;  %v6627_v28 = vpop.f32.mrb[6].mxu0  ;;  %427 = vrot.lane.b32.xlu1 %v7383_v23, %s7266_s0  ;;  %v7445_v44 = vmul.f32 0.35355338, %v7387_v26 }
  0xec   :  { %v7393_v29 = vadd.f32 %v6627_v28, %v6272_v15  ;;  %v174_v30 = vpop.f32.mrb[7].mxu0 }
  0xed   :  { %v7397_v31 = vadd.f32 %v6272_v15, %v174_v30 }
  0xee   :  { %v7434_v42 = vmul.f32 0.35355338, %v7393_v29 }
  0xef   :  { %739 = vrot.lane.b32.xlu0 %v7393_v29, %s7266_s0  ;;  %583 = vrot.lane.b32.xlu1 %v7389_v27, %s7266_s0  ;;  %v7465_v47 = vmul.f32 0.35355338, %v7397_v31 }
  0xf3   :  { %661 = vrot.lane.b32.xlu1 %v7397_v31, %s7266_s0 }
 0x155   :  { %v193_v32 = vpop.permute.xlu0 %192 }
 0x156   :  { %6629 = vmatpush3.xpose.msk.msra.mxu1 %vm194_vm2, %v193_v32 }
 0x157   :  { %6633 = vmatprep.subr.mxu1 %v7264_v14 }
 0x159   :  { %v272_v34 = vpop.permute.xlu0 %271  ;;  %6631 = vmatmul.mubr.msk.f32.vlgmr.msra.gmra.mrb[0].mxu1 %vm194_vm2, %v7403_v33  ;;  %v350_v35 = vpop.permute.xlu1 %349 }
 0x15a   :  { %6634 = vmatpush3.xpose.msk.msra.mxu1 %vm194_vm2, %v272_v34  ;;  %6635 = vmatprep.mubr.msk.f32.mxu1 %vm7265_vm1, %v7264_v14 }
 0x15b   :  { %6638 = vmatprep.subr.mxu1 %v7264_v14 }
 0x15d   :  { %v506_v37 = vpop.permute.xlu0 %505  ;;  %6636 = vmatmul.mubr.msk.f32.vlgmr.msra.gmra.mrb[2].mxu1 %vm194_vm2, %v7411_v36  ;;  %v428_v38 = vpop.permute.xlu1 %427 }
 0x15e   :  { %6639 = vmatpush3.xpose.msk.msra.mxu1 %vm194_vm2, %v350_v35  ;;  %6640 = vmatprep.mubr.msk.f32.mxu1 %vm7265_vm1, %v7264_v14 }
 0x15f   :  { %6643 = vmatprep.subr.mxu1 %v7264_v14 }
 0x161   :  { %v740_v40 = vpop.permute.xlu0 %739  ;;  %6641 = vmatmul.mubr.msk.f32.vlgmr.msra.gmra.mrb[4].mxu1 %vm194_vm2, %v7420_v39  ;;  %v584_v43 = vpop.permute.xlu1 %583 }
 0x162   :  { %6644 = vmatpush3.xpose.msk.msra.mxu1 %vm194_vm2, %v428_v38  ;;  %6664 = vmatpush3.xpose.msk.msra.mxu0 %vm194_vm2, %v740_v40 }
 0x163   :  { %6645 = vmatprep.mubr.msk.f32.mxu1 %vm7265_vm1, %v7264_v14  ;;  %6648 = vmatprep.subr.mxu1 %v7264_v14 }
 0x164   :  { %6673 = vmatprep.subr.mxu0 %v7264_v14 }
 0x165   :  { %6646 = vmatmul.mubr.msk.f32.vlgmr.msra.gmra.mrb[6].mxu1 %vm194_vm2, %v7430_v41  ;;  %6666 = vmatmul.mubr.msk.f32.vlgmr.msra.gmra.mrb[8].mxu0 %vm194_vm2, %v7434_v42  ;;  %v662_v45 = vpop.permute.xlu1 %661 }
 0x166   :  { %6649 = vmatpush3.xpose.msk.msra.mxu1 %vm194_vm2, %v506_v37  ;;  %6650 = vmatprep.mubr.msk.f32.mxu1 %vm7265_vm1, %v7264_v14 }
 0x167   :  { %6653 = vmatprep.subr.mxu1 %v7264_v14  ;;  %6675 = vmatprep.mubr.msk.f32.mxu0 %vm7265_vm1, %v7264_v14 }
 0x169   :  { %6651 = vmatmul.mubr.msk.f32.vlgmr.msra.gmra.mrb[8].mxu1 %vm194_vm2, %v7445_v44 }
 0x16a   :  { %6654 = vmatpush3.xpose.msk.msra.mxu1 %vm194_vm2, %v584_v43  ;;  %6655 = vmatprep.mubr.msk.f32.mxu1 %vm7265_vm1, %v7264_v14 }
 0x16b   :  { %6658 = vmatprep.subr.mxu1 %v7264_v14 }
 0x16d   :  { %6656 = vmatmul.mubr.msk.f32.vlgmr.msra.gmra.mrb[10].mxu1 %vm194_vm2, %v7456_v46 }
 0x16e   :  { %6659 = vmatpush3.xpose.msk.msra.mxu1 %vm194_vm2, %v662_v45  ;;  %6660 = vmatprep.mubr.msk.f32.mxu1 %vm7265_vm1, %v7264_v14 }
 0x16f   :  { %6668 = vmatprep.subr.mxu1 %v7264_v14 }
 0x171   :  { %6661 = vmatmul.mubr.msk.f32.vlgmr.msra.gmra.mrb[12].mxu1 %vm194_vm2, %v7465_v47 }
 0x172   :  { %6670 = vmatprep.mubr.msk.f32.mxu1 %vm7265_vm1, %v7264_v14 }
 0x22c   :  { %v7472_v48 = vpop.f32.mrb[0].mxu1 }
 0x22d   :  { %v6632_v49 = vpop.f32.mrb[1].mxu1  ;;  %v816_v35 = vsel %vm194_vm2, %v7472_v48, -inf }
 0x230   :  { %v344_v50 = vpop.f32.mrb[2].mxu1 }
 0x231   :  { %v6637_v51 = vpop.f32.mrb[3].mxu1  ;;  %v819_v52 = vsel %vm194_vm2, %v344_v50, -inf }
 0x232   :  { %820 = vmax.xlane.f32.xlu0 %v819_v52 }
 0x234   :  { %v7475_v53 = vpop.f32.mrb[4].mxu1 }
 0x235   :  { %v6642_v54 = vpop.f32.mrb[5].mxu1  ;;  %v822_v40 = vsel %vm194_vm2, %v7475_v53, -inf }
 0x238   :  { %v500_v55 = vpop.f32.mrb[6].mxu1  ;;  %v812_v56 = vpop.f32.mrb[8].mxu0 }
 0x239   :  { %v6647_v57 = vpop.f32.mrb[7].mxu1  ;;  %v6667_v58 = vpop.f32.mrb[9].mxu0  ;;  %v825_v59 = vsel %vm194_vm2, %v500_v55, -inf  ;;  %v837_v3 = vsel %vm194_vm2, %v812_v56, -inf }
 0x23a   :  { %826 = vmax.xlane.f32.xlu1 %v825_v59 }
 0x23c   :  { %v7478_v60 = vpop.f32.mrb[8].mxu1 }
 0x23d   :  { %v6652_v61 = vpop.f32.mrb[9].mxu1  ;;  %v828_v37 = vsel %vm194_vm2, %v7478_v60, -inf }
 0x240   :  { %v656_v62 = vpop.f32.mrb[10].mxu1 }
 0x241   :  { %v6657_v63 = vpop.f32.mrb[11].mxu1  ;;  %v831_v0 = vsel %vm194_vm2, %v656_v62, -inf }
 0x242   :  { %832 = vmax.xlane.f32.xlu0 %v831_v0 }
 0x244   :  { %v7481_v1 = vpop.f32.mrb[12].mxu1 }
 0x245   :  { %v6662_v2 = vpop.f32.mrb[13].mxu1  ;;  %v834_v38 = vsel %vm194_vm2, %v7481_v1, -inf }
 0x246   :  { %838 = vmax.xlane.f32.xlu0 %v837_v3 }
 0x24b   :  { %980 = vrot.lane.b32.xlu1 %v7379_v21, %s7267_s2 }
 0x2bf   :  { %v821_v4 = vpop.xlane.xlu0 %820 }
 0x2c0   :  { %v841_v5 = vsub.f32 %v344_v50, %v821_v4 }
 0x2c2   :  { %v850_v6 = vmul.f32 1.442695, %v841_v5 }
 0x2c4   :  { %7078 = vpow2.f32 %v850_v6 }
 0x2c7   :  { %v827_v7 = vpop.xlane.xlu1 %826 }
 0x2c8   :  { %v843_v12 = vsub.f32 %v500_v55, %v827_v7 }
 0x2ca   :  { %v854_v16 = vmul.f32 1.442695, %v843_v12 }
 0x2cb   :  { %v981_v8 = vpop.permute.xlu1 %980 }
 0x2cc   :  { %6674 = vmatpush3.msra.mxu0 %v981_v8 }
 0x2cd   :  { %6683 = vmatprep.subr.mxu0 %v7264_v14 }
 0x2ce   :  { %v7079_v9 = vpop.eup %7078 }
 0x2cf   :  { %v833_v10 = vpop.xlane.xlu0 %832  ;;  %v867_v11 = vsel %vm194_vm2, %v7079_v9, 0.0 }
 0x2d0   :  { %868 = vadd.xlane.f32.xlu1 %v867_v11  ;;  %v845_v28 = vsub.f32 %v656_v62, %v833_v10 }
 0x2d2   :  { %v858_v30 = vmul.f32 1.442695, %v845_v28 }
 0x2d3   :  { %v839_v13 = vpop.xlane.xlu0 %838 }
 0x2d4   :  { %v847_v15 = vsub.f32 %v812_v56, %v839_v13 }
 0x2d6   :  { %v862_v17 = vmul.f32 1.442695, %v847_v15 }
 0x2d8   :  { %7080 = vpow2.f32 %v862_v17 }
 0x2d9   :  { %7082 = vpow2.f32 %v854_v16 }
 0x2da   :  { %7084 = vpow2.f32 %v858_v30 }
 0x2e1   :  { %1284 = vrot.lane.b32.xlu1 %v7389_v27, %s7267_s2 }
 0x2e2   :  { %v7081_v19 = vpop.eup %7080 }
 0x2e3   :  { %v885_v20 = vsel %vm194_vm2, %v7081_v19, 0.0  ;;  %v7083_v24 = vpop.eup %7082 }
 0x2e4   :  { %886 = vadd.xlane.f32.xlu0 %v885_v20  ;;  %v873_v25 = vsel %vm194_vm2, %v7083_v24, 0.0  ;;  %v7085_v32 = vpop.eup %7084 }
 0x2e5   :  { %v879_v34 = vsel %vm194_vm2, %v7085_v32, 0.0 }
 0x2e8   :  { %874 = vadd.xlane.f32.xlu0 %v873_v25 }
 0x2fe   :  { %1132 = vrot.lane.b32.xlu0 %v7383_v23, %s7267_s2 }
 0x302   :  { %1592 = vrot.lane.b32.xlu0 %v7379_v21, %s7268_s30 }
 0x305   :  { %880 = vadd.xlane.f32.xlu1 %v879_v34 }
 0x306   :  { %1748 = vrot.lane.b32.xlu0 %v7383_v23, %s7268_s30 }
 0x30a   :  { %1904 = vrot.lane.b32.xlu0 %v7389_v27, %s7268_s30 }
 0x30e   :  { %2060 = vrot.lane.b32.xlu0 %v7393_v29, %s7268_s30 }
 0x316   :  { %1436 = vrot.lane.b32.xlu1 %v7393_v29, %s7267_s2 }
 0x31a   :  { %1590 = vrot.lane.b32.xlu1 %v7411_v36, %s7269_s9 }
 0x31e   :  { %1746 = vrot.lane.b32.xlu1 %v7430_v41, %s7269_s9 }
 0x322   :  { %1902 = vrot.lane.b32.xlu1 %v7456_v46, %s7269_s9 }
 0x326   :  { %2058 = vrot.lane.b32.xlu1 %v7434_v42, %s7269_s9 }
 0x32d   :  { %817 = vmax.xlane.f32.xlu0 %v816_v35 }
 0x331   :  { %829 = vmax.xlane.f32.xlu0 %v828_v37 }
 0x335   :  { %835 = vmax.xlane.f32.xlu0 %v834_v38 }
 0x34a   :  { %823 = vmax.xlane.f32.xlu1 %v822_v40 }
 0x35d   :  { %v869_v43 = vpop.xlane.xlu1 %868 }
 0x35e   :  { %7086 = vrcp.f32 %v869_v43 }
 0x361   :  { %v1285_v56 = vpop.permute.xlu1 %1284 }
 0x368   :  { %v7087_v45 = vpop.eup %7086 }
 0x369   :  { %v897_v49 = vmul.f32 %v7087_v45, %v7079_v9 }
 0x36b   :  { %6676 = vmatmul.mubr.msk.f32.vlgmr.msra.gmra.mrb[10].mxu0 %vm194_vm2, %v897_v49 }
 0x36c   :  { %6685 = vmatprep.mubr.msk.f32.mxu0 %vm7265_vm1, %v7264_v14 }
 0x371   :  { %v887_v50 = vpop.xlane.xlu0 %886 }
 0x375   :  { %v875_v51 = vpop.xlane.xlu0 %874 }
 0x376   :  { %7088 = vrcp.f32 %v875_v51 }
 0x379   :  { %v1133_v52 = vpop.permute.xlu0 %1132 }
 0x37a   :  { %6684 = vmatpush3.msra.mxu0 %v1133_v52 }
 0x37b   :  { %6693 = vmatprep.subr.mxu0 %v7264_v14 }
 0x37d   :  { %v1593_v63 = vpop.permute.xlu0 %1592 }
 0x380   :  { %v7089_v54 = vpop.eup %7088 }
 0x381   :  { %v899_v55 = vmul.f32 %v7089_v54, %v7083_v24  ;;  %v1749_v3 = vpop.permute.xlu0 %1748 }
 0x383   :  { %6686 = vmatmul.mubr.msk.f32.vlgmr.msra.gmra.mrb[12].mxu0 %vm194_vm2, %v899_v55 }
 0x384   :  { %6694 = vmatpush3.msra.mxu0 %v1285_v56  ;;  %6695 = vmatprep.mubr.msk.f32.mxu0 %vm7265_vm1, %v7264_v14 }
 0x385   :  { %6703 = vmatprep.subr.mxu0 %v7264_v14  ;;  %v1905_v5 = vpop.permute.xlu0 %1904 }
 0x389   :  { %v2061_v7 = vpop.permute.xlu0 %2060 }
 0x392   :  { %v881_v57 = vpop.xlane.xlu1 %880 }
 0x393   :  { %7090 = vrcp.f32 %v881_v57 }
 0x394   :  { %7092 = vrcp.f32 %v887_v50 }
 0x396   :  { %v1437_v59 = vpop.permute.xlu1 %1436 }
 0x39a   :  { %v1591_v2 = vpop.permute.xlu1 %1590 }
 0x39d   :  { %v7091_v58 = vpop.eup %7090 }
 0x39e   :  { %v901_v61 = vmul.f32 %v7091_v58, %v7085_v32  ;;  %v7093_v62 = vpop.eup %7092  ;;  %v1747_v4 = vpop.permute.xlu1 %1746 }
 0x39f   :  { %v903_v0 = vmul.f32 %v7093_v62, %v7081_v19 }
 0x3a0   :  { %6696 = vmatmul.mubr.msk.f32.vlgmr.msra.gmra.mrb[14].mxu0 %vm194_vm2, %v901_v61 }
 0x3a1   :  { %6704 = vmatpush3.msra.mxu0 %v1437_v59  ;;  %6705 = vmatprep.mubr.msk.f32.mxu0 %vm7265_vm1, %v7264_v14 }
 0x3a2   :  { %6713 = vmatprep.subr.mxu0 %v7264_v14  ;;  %v1903_v6 = vpop.permute.xlu1 %1902 }
 0x3a4   :  { %6706 = vmatmul.mubr.msk.f32.vlgmr.msra.gmra.mrb[16].mxu0 %vm194_vm2, %v903_v0 }
 0x3a5   :  { %6715 = vmatprep.mubr.msk.f32.mxu0 %vm7265_vm1, %v7264_v14 }
 0x3a6   :  { %v2059_v8 = vpop.permute.xlu1 %2058 }
 0x3a8   :  { %6714 = vmatpush3.xpose.msk.msra.mxu0 %vm194_vm2, %v1593_v63 }
 0x3a9   :  { %6723 = vmatprep.subr.mxu0 %v7264_v14 }
 0x3ab   :  { %6716 = vmatmul.mubr.msk.f32.vlgmr.msra.gmra.mrb[18].mxu0 %vm194_vm2, %v1591_v2 }
 0x3ac   :  { %6724 = vmatpush3.xpose.msk.msra.mxu0 %vm194_vm2, %v1749_v3  ;;  %6725 = vmatprep.mubr.msk.f32.mxu0 %vm7265_vm1, %v7264_v14 }
 0x3ad   :  { %6733 = vmatprep.subr.mxu0 %v7264_v14 }
 0x3af   :  { %6726 = vmatmul.mubr.msk.f32.vlgmr.msra.gmra.mrb[20].mxu0 %vm194_vm2, %v1747_v4 }
 0x3b0   :  { %6734 = vmatpush3.xpose.msk.msra.mxu0 %vm194_vm2, %v1905_v5  ;;  %6735 = vmatprep.mubr.msk.f32.mxu0 %vm7265_vm1, %v7264_v14 }
 0x3b1   :  { %6743 = vmatprep.subr.mxu0 %v7264_v14 }
 0x3b3   :  { %6736 = vmatmul.mubr.msk.f32.vlgmr.msra.gmra.mrb[22].mxu0 %vm194_vm2, %v1903_v6 }
 0x3b4   :  { %6744 = vmatpush3.xpose.msk.msra.mxu0 %vm194_vm2, %v2061_v7  ;;  %6745 = vmatprep.mubr.msk.f32.mxu0 %vm7265_vm1, %v7264_v14 }
 0x3b5   :  { %6753 = vmatprep.subr.mxu0 %v7264_v14 }
 0x3b7   :  { %6746 = vmatmul.mubr.msk.f32.vlgmr.msra.gmra.mrb[24].mxu0 %vm194_vm2, %v2059_v8 }
 0x3b8   :  { %6755 = vmatprep.mubr.msk.f32.mxu0 %vm7265_vm1, %v7264_v14 }
 0x3ba   :  { %v818_v9 = vpop.xlane.xlu0 %817 }
 0x3bb   :  { %v840_v10 = vsub.f32 %v7472_v48, %v818_v9 }
 0x3bd   :  { %v848_v11 = vmul.f32 1.442695, %v840_v10 }
 0x3be   :  { %v830_v12 = vpop.xlane.xlu0 %829 }
 0x3bf   :  { %7094 = vpow2.f32 %v848_v11  ;;  %v844_v13 = vsub.f32 %v7478_v60, %v830_v12 }
 0x3c1   :  { %v856_v15 = vmul.f32 1.442695, %v844_v13 }
 0x3c3   :  { %7096 = vpow2.f32 %v856_v15 }
 0x3c9   :  { %v7095_v16 = vpop.eup %7094 }
 0x3ca   :  { %v864_v17 = vsel %vm194_vm2, %v7095_v16, 0.0 }
 0x3cb   :  { %865 = vadd.xlane.f32.xlu1 %v864_v17 }
 0x3cd   :  { %v7559_v19 = vpop.eup %7096 }
 0x3ce   :  { %v876_v20 = vsel %vm194_vm2, %v7559_v19, 0.0 }
 0x3cf   :  { %877 = vadd.xlane.f32.xlu1 %v876_v20 }
 0x3d7   :  { %v824_v24 = vpop.xlane.xlu1 %823 }
 0x3d8   :  { %v842_v48 = vsub.f32 %v7475_v53, %v824_v24  ;;  %v836_v53 = vpop.xlane.xlu0 %835 }
 0x3d9   :  { %v846_v30 = vsub.f32 %v7481_v1, %v836_v53 }
 0x3da   :  { %v852_v25 = vmul.f32 1.442695, %v842_v48 }
 0x3db   :  { %v860_v32 = vmul.f32 1.442695, %v846_v30 }
 0x3dc   :  { %7098 = vpow2.f32 %v852_v25 }
 0x3dd   :  { %7100 = vpow2.f32 %v860_v32 }
 0x3e0   :  { %904 = vrot.lane.b32.xlu1 %v7376_v18, %s7267_s2 }
 0x3e4   :  { %1208 = vrot.lane.b32.xlu1 %v7387_v26, %s7267_s2 }
 0x3e6   :  { %v7099_v60 = vpop.eup %7098 }
 0x3e7   :  { %v870_v28 = vsel %vm194_vm2, %v7099_v60, 0.0  ;;  %v7582_v34 = vpop.eup %7100 }
 0x3e8   :  { %1360 = vrot.lane.b32.xlu1 %v7397_v31, %s7267_s2  ;;  %871 = vadd.xlane.f32.xlu0 %v870_v28  ;;  %v882_v35 = vsel %vm194_vm2, %v7582_v34, 0.0 }
 0x3ec   :  { %1512 = vrot.lane.b32.xlu1 %v7403_v33, %s7269_s9 }
 0x3f0   :  { %1668 = vrot.lane.b32.xlu1 %v7420_v39, %s7269_s9 }
 0x3f4   :  { %1824 = vrot.lane.b32.xlu1 %v7445_v44, %s7269_s9 }
 0x3f8   :  { %1980 = vrot.lane.b32.xlu1 %v7465_v47, %s7269_s9 }
 0x3fe   :  { %1056 = vrot.lane.b32.xlu0 %v7381_v22, %s7267_s2 }
 0x41d   :  { %883 = vadd.xlane.f32.xlu0 %v882_v35 }
 0x433   :  { %1514 = vrot.lane.b32.xlu0 %v7376_v18, %s7268_s30 }
 0x437   :  { %1670 = vrot.lane.b32.xlu0 %v7381_v22, %s7268_s30 }
 0x43b   :  { %1826 = vrot.lane.b32.xlu0 %v7387_v26, %s7268_s30 }
 0x43e   :  { %v7592_v37 = vpop.f32.mrb[10].mxu0 }
 0x43f   :  { %v6677_v1 = vpop.f32.mrb[11].mxu0  ;;  %1982 = vrot.lane.b32.xlu0 %v7397_v31, %s7268_s30 }
 0x456   :  { %v7596_v38 = vpop.f32.mrb[12].mxu0 }
 0x457   :  { %v6687_v40 = vpop.f32.mrb[13].mxu0 }
 0x458   :  { %v866_v43 = vpop.xlane.xlu1 %865 }
 0x459   :  { %7102 = vrcp.f32 %v866_v43 }
 0x45c   :  { %v878_v45 = vpop.xlane.xlu1 %877 }
 0x460   :  { %v905_v49 = vpop.permute.xlu1 %904 }
 0x461   :  { %6669 = vmatpush3.msra.mxu1 %v905_v49 }
 0x462   :  { %6678 = vmatprep.subr.mxu1 %v7264_v14 }
 0x463   :  { %v7103_v50 = vpop.eup %7102 }
 0x464   :  { %v896_v51 = vmul.f32 %v7103_v50, %v7095_v16  ;;  %v1209_v0 = vpop.permute.xlu1 %1208 }
 0x466   :  { %6671 = vmatmul.mubr.msk.f32.vlgmr.msra.gmra.mrb[14].mxu1 %vm194_vm2, %v896_v51 }
 0x467   :  { %6680 = vmatprep.mubr.msk.f32.mxu1 %vm7265_vm1, %v7264_v14 }
 0x468   :  { %v1361_v9 = vpop.permute.xlu1 %1360 }
 0x46c   :  { %v1513_v20 = vpop.permute.xlu1 %1512 }
 0x470   :  { %v1669_v25 = vpop.permute.xlu1 %1668 }
 0x473   :  { %v7602_v52 = vpop.f32.mrb[14].mxu0 }
 0x474   :  { %v6697_v54 = vpop.f32.mrb[15].mxu0  ;;  %v1825_v28 = vpop.permute.xlu1 %1824 }
 0x475   :  { %v872_v55 = vpop.xlane.xlu0 %871 }
 0x476   :  { %7104 = vrcp.f32 %v872_v55 }
 0x477   :  { %v7604_v56 = vpop.f32.mrb[16].mxu0  ;;  %7106 = vrcp.f32 %v878_v45 }
 0x478   :  { %v6707_v57 = vpop.f32.mrb[17].mxu0  ;;  %v1981_v30 = vpop.permute.xlu1 %1980 }
 0x479   :  { %v1057_v58 = vpop.permute.xlu0 %1056 }
 0x47a   :  { %6679 = vmatpush3.msra.mxu1 %v1057_v58 }
 0x47b   :  { %6688 = vmatprep.subr.mxu1 %v7264_v14 }
 0x47e   :  { %v7607_v59 = vpop.f32.mrb[18].mxu0 }
 0x47f   :  { %v6717_v61 = vpop.f32.mrb[19].mxu0  ;;  %v2139_v62 = vsel %vm194_vm2, %v7607_v59, -inf }
 0x480   :  { %v7105_v63 = vpop.eup %7104  ;;  %2140 = vmax.xlane.f32.xlu0 %v2139_v62 }
 0x481   :  { %v898_v2 = vmul.f32 %v7105_v63, %v7099_v60  ;;  %v7107_v3 = vpop.eup %7106 }
 0x482   :  { %v1820_v4 = vpop.f32.mrb[20].mxu0  ;;  %v900_v7 = vmul.f32 %v7107_v3, %v7559_v19 }
 0x483   :  { %v6727_v5 = vpop.f32.mrb[21].mxu0  ;;  %v2145_v6 = vsel %vm194_vm2, %v1820_v4, -inf  ;;  %6681 = vmatmul.mubr.msk.f32.vlgmr.msra.gmra.mrb[16].mxu1 %vm194_vm2, %v898_v2 }
 0x484   :  { %2146 = vmax.xlane.f32.xlu1 %v2145_v6  ;;  %6689 = vmatpush3.msra.mxu1 %v1209_v0 }
 0x485   :  { %6690 = vmatprep.mubr.msk.f32.mxu1 %vm7265_vm1, %v7264_v14  ;;  %6698 = vmatprep.subr.mxu1 %v7264_v14 }
 0x486   :  { %v1976_v8 = vpop.f32.mrb[22].mxu0 }
 0x487   :  { %v6737_v10 = vpop.f32.mrb[23].mxu0  ;;  %v2151_v11 = vsel %vm194_vm2, %v1976_v8, -inf  ;;  %6691 = vmatmul.mubr.msk.f32.vlgmr.msra.gmra.mrb[18].mxu1 %vm194_vm2, %v900_v7 }
 0x488   :  { %2152 = vmax.xlane.f32.xlu0 %v2151_v11  ;;  %6699 = vmatpush3.msra.mxu1 %v1361_v9 }
 0x489   :  { %6700 = vmatprep.mubr.msk.f32.mxu1 %vm7265_vm1, %v7264_v14  ;;  %6708 = vmatprep.subr.mxu1 %v7264_v14 }
 0x48a   :  { %v7622_v12 = vpop.f32.mrb[24].mxu0 }
 0x48b   :  { %v6747_v13 = vpop.f32.mrb[25].mxu0  ;;  %v2157_v15 = vsel %vm194_vm2, %v7622_v12, -inf }
 0x48c   :  { %2158 = vmax.xlane.f32.xlu0 %v2157_v15 }
 0x495   :  { %2300 = vrot.lane.b32.xlu1 %v7379_v21, %s7270_s10 }
 0x499   :  { %2604 = vrot.lane.b32.xlu1 %v7389_v27, %s7270_s10 }
 0x4a2   :  { %2452 = vrot.lane.b32.xlu0 %v7383_v23, %s7270_s10 }
 0x4aa   :  { %v884_v16 = vpop.xlane.xlu0 %883 }
 0x4ab   :  { %7108 = vrcp.f32 %v884_v16 }
 0x4ae   :  { %v1515_v17 = vpop.permute.xlu0 %1514 }
 0x4b2   :  { %v1671_v48 = vpop.permute.xlu0 %1670 }
 0x4b5   :  { %v7109_v19 = vpop.eup %7108 }
 0x4b6   :  { %v902_v24 = vmul.f32 %v7109_v19, %v7582_v34  ;;  %v1827_v60 = vpop.permute.xlu0 %1826 }
 0x4b8   :  { %6701 = vmatmul.mubr.msk.f32.vlgmr.msra.gmra.mrb[20].mxu1 %vm194_vm2, %v902_v24 }
 0x4b9   :  { %6709 = vmatpush3.xpose.msk.msra.mxu1 %vm194_vm2, %v1515_v17  ;;  %6710 = vmatprep.mubr.msk.f32.mxu1 %vm7265_vm1, %v7264_v14 }
 0x4ba   :  { %6718 = vmatprep.subr.mxu1 %v7264_v14  ;;  %v1983_v53 = vpop.permute.xlu0 %1982 }
 0x4bc   :  { %6711 = vmatmul.mubr.msk.f32.vlgmr.msra.gmra.mrb[22].mxu1 %vm194_vm2, %v1513_v20 }
 0x4bd   :  { %6719 = vmatpush3.xpose.msk.msra.mxu1 %vm194_vm2, %v1671_v48  ;;  %6720 = vmatprep.mubr.msk.f32.mxu1 %vm7265_vm1, %v7264_v14 }
 0x4be   :  { %6728 = vmatprep.subr.mxu1 %v7264_v14 }
 0x4c0   :  { %6721 = vmatmul.mubr.msk.f32.vlgmr.msra.gmra.mrb[24].mxu1 %vm194_vm2, %v1669_v25 }
 0x4c1   :  { %6729 = vmatpush3.xpose.msk.msra.mxu1 %vm194_vm2, %v1827_v60  ;;  %6730 = vmatprep.mubr.msk.f32.mxu1 %vm7265_vm1, %v7264_v14 }
 0x4c2   :  { %6738 = vmatprep.subr.mxu1 %v7264_v14 }
 0x4c4   :  { %6731 = vmatmul.mubr.msk.f32.vlgmr.msra.gmra.mrb[26].mxu1 %vm194_vm2, %v1825_v28 }
 0x4c5   :  { %6739 = vmatpush3.xpose.msk.msra.mxu1 %vm194_vm2, %v1983_v53  ;;  %6740 = vmatprep.mubr.msk.f32.mxu1 %vm7265_vm1, %v7264_v14 }
 0x4c6   :  { %6748 = vmatprep.subr.mxu1 %v7264_v14 }
 0x4c8   :  { %6741 = vmatmul.mubr.msk.f32.vlgmr.msra.gmra.mrb[28].mxu1 %vm194_vm2, %v1981_v30 }
 0x4c9   :  { %6750 = vmatprep.mubr.msk.f32.mxu1 %vm7265_vm1, %v7264_v14 }
 0x50d   :  { %v2141_v32 = vpop.xlane.xlu0 %2140 }
 0x50e   :  { %v2161_v34 = vsub.f32 %v7607_v59, %v2141_v32 }
 0x510   :  { %v2170_v35 = vmul.f32 1.442695, %v2161_v34 }
 0x511   :  { %v2147_v1 = vpop.xlane.xlu1 %2146 }
 0x512   :  { %7110 = vpow2.f32 %v2170_v35  ;;  %v2163_v40 = vsub.f32 %v1820_v4, %v2147_v1 }
 0x514   :  { %v2174_v43 = vmul.f32 1.442695, %v2163_v40 }
 0x515   :  { %v2301_v45 = vpop.permute.xlu1 %2300  ;;  %v2153_v49 = vpop.xlane.xlu0 %2152 }
 0x516   :  { %7112 = vpow2.f32 %v2174_v43  ;;  %v2165_v50 = vsub.f32 %v1976_v8, %v2153_v49  ;;  %6754 = vmatpush3.msra.mxu0 %v2301_v45 }
 0x517   :  { %6763 = vmatprep.subr.mxu0 %v7264_v14 }
 0x518   :  { %v2178_v51 = vmul.f32 1.442695, %v2165_v50 }
 0x519   :  { %v2159_v0 = vpop.xlane.xlu0 %2158  ;;  %v2605_v60 = vpop.permute.xlu1 %2604 }
 0x51a   :  { %7114 = vpow2.f32 %v2178_v51  ;;  %v2167_v2 = vsub.f32 %v7622_v12, %v2159_v0 }
 0x51c   :  { %v7658_v54 = vpop.eup %7110  ;;  %v2182_v3 = vmul.f32 1.442695, %v2167_v2 }
 0x51d   :  { %v2187_v55 = vsel %vm194_vm2, %v7658_v54, 0.0  ;;  %v2453_v53 = vpop.permute.xlu0 %2452 }
 0x51e   :  { %2188 = vadd.xlane.f32.xlu1 %v2187_v55  ;;  %7116 = vpow2.f32 %v2182_v3 }
 0x520   :  { %v7662_v57 = vpop.eup %7112 }
 0x521   :  { %v2193_v58 = vsel %vm194_vm2, %v7662_v57, 0.0 }
 0x522   :  { %2194 = vadd.xlane.f32.xlu0 %v2193_v58 }
 0x524   :  { %v7666_v59 = vpop.eup %7114 }
 0x525   :  { %v2199_v61 = vsel %vm194_vm2, %v7666_v59, 0.0 }
 0x526   :  { %2200 = vadd.xlane.f32.xlu1 %v2199_v61 }
 0x528   :  { %v7686_v5 = vpop.eup %7116 }
 0x529   :  { %v2205_v7 = vsel %vm194_vm2, %v7686_v5, 0.0 }
 0x537   :  { %2756 = vrot.lane.b32.xlu1 %v7393_v29, %s7270_s10 }
 0x538   :  { %3092 = vrot.lane.b32.xlu0 %v7376_v18, %s7271_s11 }
 0x539   :  { %v7673_v62 = vpop.f32.mrb[14].mxu1 }
 0x53a   :  { %v6672_v63 = vpop.f32.mrb[15].mxu1 }
 0x53b   :  { %3090 = vrot.lane.b32.xlu1 %v7403_v33, %s7272_s12 }
 0x53c   :  { %3170 = vrot.lane.b32.xlu0 %v7379_v21, %s7271_s11 }
 0x53f   :  { %3168 = vrot.lane.b32.xlu1 %v7411_v36, %s7272_s12 }
 0x543   :  { %3246 = vrot.lane.b32.xlu1 %v7420_v39, %s7272_s12 }
 0x547   :  { %3324 = vrot.lane.b32.xlu1 %v7430_v41, %s7272_s12 }
 0x54b   :  { %3402 = vrot.lane.b32.xlu1 %v7445_v44, %s7272_s12 }
 0x54f   :  { %3480 = vrot.lane.b32.xlu1 %v7456_v46, %s7272_s12 }
 0x553   :  { %3558 = vrot.lane.b32.xlu1 %v7465_v47, %s7272_s12 }
 0x556   :  { %v7684_v4 = vpop.f32.mrb[16].mxu1 }
 0x557   :  { %3636 = vrot.lane.b32.xlu1 %v7434_v42, %s7272_s12  ;;  %v6682_v6 = vpop.f32.mrb[17].mxu1 }
 0x55a   :  { %v7691_v8 = vpop.f32.mrb[18].mxu1 }
 0x55b   :  { %2206 = vadd.xlane.f32.xlu0 %v2205_v7  ;;  %v6692_v9 = vpop.f32.mrb[19].mxu1 }
 0x571   :  { %3248 = vrot.lane.b32.xlu0 %v7381_v22, %s7271_s11 }
 0x575   :  { %3326 = vrot.lane.b32.xlu0 %v7383_v23, %s7271_s11 }
 0x579   :  { %3404 = vrot.lane.b32.xlu0 %v7387_v26, %s7271_s11 }
 0x57d   :  { %3482 = vrot.lane.b32.xlu0 %v7389_v27, %s7271_s11 }
 0x581   :  { %3560 = vrot.lane.b32.xlu0 %v7397_v31, %s7271_s11 }
 0x585   :  { %3638 = vrot.lane.b32.xlu0 %v7393_v29, %s7271_s11 }
 0x58b   :  { %v7699_v10 = vpop.f32.mrb[20].mxu1 }
 0x58c   :  { %v6702_v11 = vpop.f32.mrb[21].mxu1 }
 0x58f   :  { %v7701_v12 = vpop.f32.mrb[22].mxu1 }
 0x590   :  { %v6712_v13 = vpop.f32.mrb[23].mxu1  ;;  %v2136_v25 = vsel %vm194_vm2, %v7701_v12, -inf }
 0x593   :  { %v7703_v15 = vpop.f32.mrb[24].mxu1 }
 0x594   :  { %v6722_v16 = vpop.f32.mrb[25].mxu1  ;;  %v2142_v17 = vsel %vm194_vm2, %v7703_v15, -inf }
 0x595   :  { %2143 = vmax.xlane.f32.xlu1 %v2142_v17 }
 0x597   :  { %v7707_v19 = vpop.f32.mrb[26].mxu1 }
 0x598   :  { %v6732_v20 = vpop.f32.mrb[27].mxu1  ;;  %v2148_v28 = vsel %vm194_vm2, %v7707_v19, -inf }
 0x59b   :  { %v7709_v24 = vpop.f32.mrb[28].mxu1 }
 0x59c   :  { %v6742_v48 = vpop.f32.mrb[29].mxu1  ;;  %v2154_v32 = vsel %vm194_vm2, %v7709_v24, -inf }
 0x5a4   :  { %2137 = vmax.xlane.f32.xlu0 %v2136_v25 }
 0x5a8   :  { %2149 = vmax.xlane.f32.xlu0 %v2148_v28 }
 0x5ab   :  { %v2189_v30 = vpop.xlane.xlu1 %2188 }
 0x5ac   :  { %7118 = vrcp.f32 %v2189_v30  ;;  %2155 = vmax.xlane.f32.xlu0 %v2154_v32 }
 0x5af   :  { %v2195_v34 = vpop.xlane.xlu0 %2194 }
 0x5b0   :  { %7120 = vrcp.f32 %v2195_v34 }
 0x5b3   :  { %v2201_v35 = vpop.xlane.xlu1 %2200 }
 0x5b4   :  { %7122 = vrcp.f32 %v2201_v35 }
 0x5b6   :  { %v7119_v1 = vpop.eup %7118 }
 0x5b7   :  { %v2217_v40 = vmul.f32 %v7119_v1, %v7658_v54  ;;  %v2757_v51 = vpop.permute.xlu1 %2756  ;;  %v3093_v54 = vpop.permute.xlu0 %3092 }
 0x5b9   :  { %6756 = vmatmul.mubr.msk.f32.vlgmr.msra.gmra.mrb[26].mxu0 %vm194_vm2, %v2217_v40 }
 0x5ba   :  { %v7121_v43 = vpop.eup %7120  ;;  %6764 = vmatpush3.msra.mxu0 %v2453_v53  ;;  %6765 = vmatprep.mubr.msk.f32.mxu0 %vm7265_vm1, %v7264_v14 }
 0x5bb   :  { %6773 = vmatprep.subr.mxu0 %v7264_v14  ;;  %v2219_v45 = vmul.f32 %v7121_v43, %v7662_v57  ;;  %v3171_v55 = vpop.permute.xlu0 %3170  ;;  %v3091_v58 = vpop.permute.xlu1 %3090 }
 0x5bd   :  { %6766 = vmatmul.mubr.msk.f32.vlgmr.msra.gmra.mrb[28].mxu0 %vm194_vm2, %v2219_v45 }
 0x5be   :  { %v7123_v49 = vpop.eup %7122  ;;  %6774 = vmatpush3.msra.mxu0 %v2605_v60  ;;  %6775 = vmatprep.mubr.msk.f32.mxu0 %vm7265_vm1, %v7264_v14 }
 0x5bf   :  { %6783 = vmatprep.subr.mxu0 %v7264_v14  ;;  %v2221_v50 = vmul.f32 %v7123_v49, %v7666_v59  ;;  %v3169_v61 = vpop.permute.xlu1 %3168 }
 0x5c1   :  { %6776 = vmatmul.mubr.msk.f32.vlgmr.msra.gmra.mrb[30].mxu0 %vm194_vm2, %v2221_v50 }
 0x5c2   :  { %6784 = vmatpush3.msra.mxu0 %v2757_v51  ;;  %6785 = vmatprep.mubr.msk.f32.mxu0 %vm7265_vm1, %v7264_v14 }
 0x5c3   :  { %6816 = vmatprep.subr.mxu0 %v7264_v14  ;;  %v3247_v59 = vpop.permute.xlu1 %3246 }
 0x5e8   :  { %v2207_v57 = vpop.xlane.xlu0 %2206 }
 0x5e9   :  { %7124 = vrcp.f32 %v2207_v57 }
 0x5ec   :  { %v3249_v0 = vpop.permute.xlu0 %3248 }
 0x5f0   :  { %v3327_v3 = vpop.permute.xlu0 %3326 }
 0x5f3   :  { %v7125_v63 = vpop.eup %7124 }
 0x5f4   :  { %v2223_v2 = vmul.f32 %v7125_v63, %v7686_v5  ;;  %v3325_v5 = vpop.permute.xlu1 %3324  ;;  %v3405_v6 = vpop.permute.xlu0 %3404 }
 0x5f6   :  { %6786 = vmatmul.mubr.msk.f32.vlgmr.msra.gmra.mrb[32].mxu0 %vm194_vm2, %v2223_v2 }
 0x5f7   :  { %6817 = vmatpush3.xpose.msk.msra.mxu0 %vm194_vm2, %v3093_v54  ;;  %6818 = vmatprep.mubr.msk.f32.mxu0 %vm7265_vm1, %v7264_v14 }
 0x5f8   :  { %6821 = vmatprep.subr.mxu0 %v7264_v14  ;;  %v3403_v7 = vpop.permute.xlu1 %3402  ;;  %v3483_v9 = vpop.permute.xlu0 %3482 }
 0x5fa   :  { %6819 = vmatmul.mubr.msk.f32.vlgmr.msra.gmra.mrb[34].mxu0 %vm194_vm2, %v3091_v58 }
 0x5fb   :  { %6822 = vmatpush3.xpose.msk.msra.mxu0 %vm194_vm2, %v3171_v55  ;;  %6823 = vmatprep.mubr.msk.f32.mxu0 %vm7265_vm1, %v7264_v14 }
 0x5fc   :  { %6826 = vmatprep.subr.mxu0 %v7264_v14  ;;  %v3481_v11 = vpop.permute.xlu1 %3480  ;;  %v3561_v13 = vpop.permute.xlu0 %3560 }
 0x5fe   :  { %6824 = vmatmul.mubr.msk.f32.vlgmr.msra.gmra.mrb[36].mxu0 %vm194_vm2, %v3169_v61 }
 0x5ff   :  { %6827 = vmatpush3.xpose.msk.msra.mxu0 %vm194_vm2, %v3249_v0  ;;  %6828 = vmatprep.mubr.msk.f32.mxu0 %vm7265_vm1, %v7264_v14 }
 0x600   :  { %6831 = vmatprep.subr.mxu0 %v7264_v14  ;;  %v3559_v16 = vpop.permute.xlu1 %3558  ;;  %v3639_v17 = vpop.permute.xlu0 %3638 }
 0x602   :  { %6829 = vmatmul.mubr.msk.f32.vlgmr.msra.gmra.mrb[38].mxu0 %vm194_vm2, %v3247_v59 }
 0x603   :  { %6832 = vmatpush3.xpose.msk.msra.mxu0 %vm194_vm2, %v3327_v3  ;;  %6833 = vmatprep.mubr.msk.f32.mxu0 %vm7265_vm1, %v7264_v14 }
 0x604   :  { %6836 = vmatprep.subr.mxu0 %v7264_v14  ;;  %v3637_v20 = vpop.permute.xlu1 %3636 }
 0x606   :  { %6834 = vmatmul.mubr.msk.f32.vlgmr.msra.gmra.mrb[40].mxu0 %vm194_vm2, %v3325_v5 }
 0x607   :  { %6837 = vmatpush3.xpose.msk.msra.mxu0 %vm194_vm2, %v3405_v6  ;;  %6838 = vmatprep.mubr.msk.f32.mxu0 %vm7265_vm1, %v7264_v14 }
 0x608   :  { %6841 = vmatprep.subr.mxu0 %v7264_v14 }
 0x60a   :  { %6839 = vmatmul.mubr.msk.f32.vlgmr.msra.gmra.mrb[42].mxu0 %vm194_vm2, %v3403_v7 }
 0x60b   :  { %6842 = vmatpush3.xpose.msk.msra.mxu0 %vm194_vm2, %v3483_v9  ;;  %6843 = vmatprep.mubr.msk.f32.mxu0 %vm7265_vm1, %v7264_v14 }
 0x60c   :  { %6846 = vmatprep.subr.mxu0 %v7264_v14 }
 0x60e   :  { %6844 = vmatmul.mubr.msk.f32.vlgmr.msra.gmra.mrb[44].mxu0 %vm194_vm2, %v3481_v11 }
 0x60f   :  { %6847 = vmatpush3.xpose.msk.msra.mxu0 %vm194_vm2, %v3561_v13  ;;  %6848 = vmatprep.mubr.msk.f32.mxu0 %vm7265_vm1, %v7264_v14 }
 0x610   :  { %6851 = vmatprep.subr.mxu0 %v7264_v14 }
 0x612   :  { %6849 = vmatmul.mubr.msk.f32.vlgmr.msra.gmra.mrb[46].mxu0 %vm194_vm2, %v3559_v16 }
 0x613   :  { %6852 = vmatpush3.xpose.msk.msra.mxu0 %vm194_vm2, %v3639_v17  ;;  %6853 = vmatprep.mubr.msk.f32.mxu0 %vm7265_vm1, %v7264_v14 }
 0x614   :  { %6861 = vmatprep.subr.mxu0 %v7264_v14 }
 0x616   :  { %6854 = vmatmul.mubr.msk.f32.vlgmr.msra.gmra.mrb[48].mxu0 %vm194_vm2, %v3637_v20 }
 0x617   :  { %6863 = vmatprep.mubr.msk.f32.mxu0 %vm7265_vm1, %v7264_v14 }
 0x622   :  { %v2144_v48 = vpop.xlane.xlu1 %2143 }
 0x623   :  { %v2162_v25 = vsub.f32 %v7703_v15, %v2144_v48 }
 0x625   :  { %v2172_v60 = vmul.f32 1.442695, %v2162_v25 }
 0x627   :  { %7126 = vpow2.f32 %v2172_v60 }
 0x631   :  { %v7777_v28 = vpop.eup %7126  ;;  %v2138_v53 = vpop.xlane.xlu0 %2137 }
 0x632   :  { %v2160_v30 = vsub.f32 %v7701_v12, %v2138_v53  ;;  %v2190_v32 = vsel %vm194_vm2, %v7777_v28, 0.0 }
 0x633   :  { %2191 = vadd.xlane.f32.xlu0 %v2190_v32 }
 0x634   :  { %v2168_v34 = vmul.f32 1.442695, %v2160_v30 }
 0x635   :  { %v2150_v35 = vpop.xlane.xlu0 %2149 }
 0x636   :  { %7128 = vpow2.f32 %v2168_v34  ;;  %v2164_v1 = vsub.f32 %v7707_v19, %v2150_v35 }
 0x638   :  { %v2176_v40 = vmul.f32 1.442695, %v2164_v1 }
 0x639   :  { %v2156_v43 = vpop.xlane.xlu0 %2155 }
 0x63a   :  { %7130 = vpow2.f32 %v2176_v40  ;;  %v2166_v15 = vsub.f32 %v7709_v24, %v2156_v43 }
 0x63c   :  { %v2180_v45 = vmul.f32 1.442695, %v2166_v15 }
 0x63e   :  { %7132 = vpow2.f32 %v2180_v45 }
 0x640   :  { %v7129_v49 = vpop.eup %7128 }
 0x641   :  { %v2184_v50 = vsel %vm194_vm2, %v7129_v49, 0.0 }
 0x642   :  { %2185 = vadd.xlane.f32.xlu1 %v2184_v50 }
 0x644   :  { %v7785_v12 = vpop.eup %7130 }
 0x645   :  { %v2196_v51 = vsel %vm194_vm2, %v7785_v12, 0.0 }
 0x646   :  { %2197 = vadd.xlane.f32.xlu1 %v2196_v51 }
 0x648   :  { %v7789_v54 = vpop.eup %7132 }
 0x649   :  { %v2202_v19 = vsel %vm194_vm2, %v7789_v54, 0.0 }
 0x64a   :  { %2203 = vadd.xlane.f32.xlu0 %v2202_v19 }
 0x657   :  { %2224 = vrot.lane.b32.xlu1 %v7376_v18, %s7270_s10 }
 0x65b   :  { %2528 = vrot.lane.b32.xlu1 %v7387_v26, %s7270_s10 }
 0x65f   :  { %2680 = vrot.lane.b32.xlu1 %v7397_v31, %s7270_s10 }
 0x660   :  { %2376 = vrot.lane.b32.xlu0 %v7381_v22, %s7270_s10 }
 0x68c   :  { %v7801_v24 = vpop.f32.mrb[26].mxu0 }
 0x68d   :  { %v6757_v55 = vpop.f32.mrb[27].mxu0 }
 0x690   :  { %v7803_v57 = vpop.f32.mrb[28].mxu0 }
 0x691   :  { %v6767_v58 = vpop.f32.mrb[29].mxu0 }
 0x694   :  { %v7805_v61 = vpop.f32.mrb[30].mxu0 }
 0x695   :  { %v6777_v63 = vpop.f32.mrb[31].mxu0 }
 0x6c0   :  { %v2192_v6 = vpop.xlane.xlu0 %2191 }
 0x6c9   :  { %v7807_v0 = vpop.f32.mrb[32].mxu0 }
 0x6ca   :  { %v6787_v2 = vpop.f32.mrb[33].mxu0 }
 0x6cd   :  { %v7809_v59 = vpop.f32.mrb[34].mxu0 }
 0x6ce   :  { %v6820_v3 = vpop.f32.mrb[35].mxu0  ;;  %v3714_v5 = vsel %vm194_vm2, %v7809_v59, -inf }
 0x6cf   :  { %v2186_v7 = vpop.xlane.xlu1 %2185  ;;  %3715 = vmax.xlane.f32.xlu0 %v3714_v5 }
 0x6d0   :  { %7134 = vrcp.f32 %v2186_v7 }
 0x6d1   :  { %v7813_v9 = vpop.f32.mrb[36].mxu0  ;;  %7136 = vrcp.f32 %v2192_v6 }
 0x6d2   :  { %v6825_v11 = vpop.f32.mrb[37].mxu0  ;;  %v3717_v13 = vsel %vm194_vm2, %v7813_v9, -inf }
 0x6d3   :  { %3718 = vmax.xlane.f32.xlu1 %v3717_v13  ;;  %v2198_v16 = vpop.xlane.xlu1 %2197 }
 0x6d4   :  { %7138 = vrcp.f32 %v2198_v16  ;;  %v7869_v16 = vld [vmem:[%s8231_s3] sm:$0xff] }
 0x6d5   :  { %v7817_v17 = vpop.f32.mrb[38].mxu0 }
 0x6d6   :  { %v6830_v20 = vpop.f32.mrb[39].mxu0  ;;  %v3720_v48 = vsel %vm194_vm2, %v7817_v17, -inf }
 0x6d7   :  { %v2225_v25 = vpop.permute.xlu1 %2224  ;;  %3721 = vmax.xlane.f32.xlu0 %v3720_v48  ;;  %v2204_v60 = vpop.xlane.xlu0 %2203 }
 0x6d8   :  { %6749 = vmatpush3.msra.mxu1 %v2225_v25  ;;  %7140 = vrcp.f32 %v2204_v60 }
 0x6d9   :  { %v7821_v53 = vpop.f32.mrb[40].mxu0  ;;  %6758 = vmatprep.subr.mxu1 %v7264_v14 }
 0x6da   :  { %v7135_v30 = vpop.eup %7134  ;;  %v6835_v32 = vpop.f32.mrb[41].mxu0  ;;  %v3723_v34 = vsel %vm194_vm2, %v7821_v53, -inf }
 0x6db   :  { %v2216_v35 = vmul.f32 %v7135_v30, %v7129_v49  ;;  %3724 = vmax.xlane.f32.xlu0 %v3723_v34  ;;  %v2377_v1 = vpop.permute.xlu0 %2376  ;;  %v7137_v40 = vpop.eup %7136 }
 0x6dc   :  { %v2218_v50 = vmul.f32 %v7137_v40, %v7777_v28  ;;  %v2529_v51 = vpop.permute.xlu1 %2528 }
 0x6dd   :  { %6751 = vmatmul.mubr.msk.f32.vlgmr.msra.gmra.mrb[30].mxu1 %vm194_vm2, %v2216_v35  ;;  %v7827_v43 = vpop.f32.mrb[42].mxu0 }
 0x6de   :  { %6759 = vmatpush3.msra.mxu1 %v2377_v1  ;;  %v6840_v15 = vpop.f32.mrb[43].mxu0  ;;  %v3726_v45 = vsel %vm194_vm2, %v7827_v43, -inf  ;;  %6760 = vmatprep.mubr.msk.f32.mxu1 %vm7265_vm1, %v7264_v14  ;;  %v7139_v49 = vpop.eup %7138 }
 0x6df   :  { %3727 = vmax.xlane.f32.xlu1 %v3726_v45  ;;  %6768 = vmatprep.subr.mxu1 %v7264_v14  ;;  %v2220_v63 = vmul.f32 %v7139_v49, %v7785_v12 }
 0x6e0   :  { %v2681_v2 = vpop.permute.xlu1 %2680 }
 0x6e1   :  { %6761 = vmatmul.mubr.msk.f32.vlgmr.msra.gmra.mrb[32].mxu1 %vm194_vm2, %v2218_v50  ;;  %v7836_v19 = vpop.f32.mrb[44].mxu0 }
 0x6e2   :  { %6769 = vmatpush3.msra.mxu1 %v2529_v51  ;;  %v6845_v55 = vpop.f32.mrb[45].mxu0  ;;  %v3729_v58 = vsel %vm194_vm2, %v7836_v19, -inf  ;;  %6770 = vmatprep.mubr.msk.f32.mxu1 %vm7265_vm1, %v7264_v14  ;;  %v7141_v28 = vpop.eup %7140 }
 0x6e3   :  { %3730 = vmax.xlane.f32.xlu0 %v3729_v58  ;;  %6778 = vmatprep.subr.mxu1 %v7264_v14  ;;  %v2222_v7 = vmul.f32 %v7141_v28, %v7789_v54  ;;  %v39_v54 = vld [vmem:[%s8231_s3 + $0x8] sm:$0xff] }
 0x6e5   :  { %6771 = vmatmul.mubr.msk.f32.vlgmr.msra.gmra.mrb[34].mxu1 %vm194_vm2, %v2220_v63  ;;  %v3632_v3 = vpop.f32.mrb[46].mxu0 }
 0x6e6   :  { %6779 = vmatpush3.msra.mxu1 %v2681_v2  ;;  %v6850_v5 = vpop.f32.mrb[47].mxu0  ;;  %v3732_v6 = vsel %vm194_vm2, %v3632_v3, -inf  ;;  %6780 = vmatprep.mubr.msk.f32.mxu1 %vm7265_vm1, %v7264_v14 }
 0x6e7   :  { %3733 = vmax.xlane.f32.xlu1 %v3732_v6  ;;  %6788 = vmatprep.subr.mxu1 %v39_v54 }
 0x6e9   :  { %6781 = vmatmul.mubr.msk.f32.vlgmr.msra.gmra.mrb[36].mxu1 %vm194_vm2, %v2222_v7  ;;  %v3710_v12 = vpop.f32.mrb[48].mxu0 }
 0x6ea   :  { %v6855_v11 = vpop.f32.mrb[49].mxu0  ;;  %v3735_v13 = vsel %vm194_vm2, %v3710_v12, -inf  ;;  %6789 = vmatpush3.msra.mxu1 %v39_v54 }
 0x6eb   :  { %3736 = vmax.xlane.f32.xlu0 %v3735_v13  ;;  %6802 = vmatprep.subr.mxu1 %v7869_v16 }
 0x6f8   :  { %3802 = vrot.lane.b32.xlu1 %v7376_v18, %s7273_s13 }
 0x6fc   :  { %3954 = vrot.lane.b32.xlu1 %v7381_v22, %s7273_s13 }
 0x700   :  { %4030 = vrot.lane.b32.xlu1 %v7383_v23, %s7273_s13 }
 0x701   :  { %3878 = vrot.lane.b32.xlu0 %v7379_v21, %s7273_s13 }
 0x704   :  { %4182 = vrot.lane.b32.xlu1 %v7389_v27, %s7273_s13 }
 0x705   :  { %4106 = vrot.lane.b32.xlu0 %v7387_v26, %s7273_s13 }
 0x75c   :  { %v3716_v20 = vpop.xlane.xlu0 %3715 }
 0x75d   :  { %v3738_v48 = vsub.f32 %v7809_v59, %v3716_v20 }
 0x75f   :  { %v3746_v25 = vmul.f32 1.442695, %v3738_v48 }
 0x760   :  { %v3719_v60 = vpop.xlane.xlu1 %3718 }
 0x761   :  { %7142 = vpow2.f32 %v3746_v25  ;;  %v3739_v30 = vsub.f32 %v7813_v9, %v3719_v60 }
 0x763   :  { %v3748_v32 = vmul.f32 1.442695, %v3739_v30 }
 0x764   :  { %v3722_v34 = vpop.xlane.xlu0 %3721 }
 0x765   :  { %7144 = vpow2.f32 %v3748_v32  ;;  %v3740_v35 = vsub.f32 %v7817_v17, %v3722_v34 }
 0x767   :  { %v3750_v1 = vmul.f32 1.442695, %v3740_v35 }
 0x768   :  { %v3725_v40 = vpop.xlane.xlu0 %3724 }
 0x769   :  { %7146 = vpow2.f32 %v3750_v1  ;;  %v3741_v15 = vsub.f32 %v7821_v53, %v3725_v40 }
 0x76b   :  { %v7876_v45 = vpop.eup %7142  ;;  %v3752_v50 = vmul.f32 1.442695, %v3741_v15 }
 0x76c   :  { %v3728_v51 = vpop.xlane.xlu1 %3727  ;;  %v3762_v59 = vsel %vm194_vm2, %v7876_v45, 0.0 }
 0x76d   :  { %7148 = vpow2.f32 %v3752_v50  ;;  %v3742_v9 = vsub.f32 %v7827_v43, %v3728_v51  ;;  %3763 = vadd.xlane.f32.xlu1 %v3762_v59 }
 0x76f   :  { %v7881_v49 = vpop.eup %7144  ;;  %v3754_v55 = vmul.f32 1.442695, %v3742_v9 }
 0x770   :  { %v3731_v17 = vpop.xlane.xlu0 %3730  ;;  %v3765_v58 = vsel %vm194_vm2, %v7881_v49, 0.0 }
 0x771   :  { %7150 = vpow2.f32 %v3754_v55  ;;  %v3743_v53 = vsub.f32 %v7836_v19, %v3731_v17  ;;  %3766 = vadd.xlane.f32.xlu0 %v3765_v58  ;;  %v40_v58 = vld [vmem:[%s8231_s3 + $0x10] sm:$0xff] }
 0x773   :  { %v7886_v63 = vpop.eup %7146  ;;  %v3756_v28 = vmul.f32 1.442695, %v3743_v53 }
 0x774   :  { %v3734_v2 = vpop.xlane.xlu1 %3733  ;;  %v3768_v5 = vsel %vm194_vm2, %v7886_v63, 0.0 }
 0x775   :  { %7152 = vpow2.f32 %v3756_v28  ;;  %v3744_v43 = vsub.f32 %v3632_v3, %v3734_v2  ;;  %3769 = vadd.xlane.f32.xlu1 %v3768_v5 }
 0x777   :  { %v7890_v6 = vpop.eup %7148  ;;  %v3758_v7 = vmul.f32 1.442695, %v3744_v43 }
 0x778   :  { %v3737_v11 = vpop.xlane.xlu0 %3736  ;;  %v3771_v13 = vsel %vm194_vm2, %v7890_v6, 0.0 }
 0x779   :  { %7154 = vpow2.f32 %v3758_v7  ;;  %v3745_v19 = vsub.f32 %v3710_v12, %v3737_v11  ;;  %3772 = vadd.xlane.f32.xlu0 %v3771_v13 }
 0x77b   :  { %v7894_v54 = vpop.eup %7150  ;;  %v3760_v20 = vmul.f32 1.442695, %v3745_v19 }
 0x77c   :  { %v3879_v48 = vpop.permute.xlu0 %3878  ;;  %v3774_v25 = vsel %vm194_vm2, %v7894_v54, 0.0 }
 0x77d   :  { %7156 = vpow2.f32 %v3760_v20  ;;  %3775 = vadd.xlane.f32.xlu1 %v3774_v25  ;;  %6862 = vmatpush3.msra.mxu0 %v3879_v48 }
 0x77e   :  { %6871 = vmatprep.subr.mxu0 %v7264_v14 }
 0x77f   :  { %v7899_v3 = vpop.eup %7152 }
 0x780   :  { %v3777_v60 = vsel %vm194_vm2, %v7899_v3, 0.0 }
 0x781   :  { %3778 = vadd.xlane.f32.xlu0 %v3777_v60 }
 0x783   :  { %v7903_v12 = vpop.eup %7154 }
 0x784   :  { %v3780_v30 = vsel %vm194_vm2, %v7903_v12, 0.0 }
 0x785   :  { %3781 = vadd.xlane.f32.xlu1 %v3780_v30 }
 0x787   :  { %v7907_v32 = vpop.eup %7156 }
 0x788   :  { %v3783_v34 = vsel %vm194_vm2, %v7907_v32, 0.0 }
 0x789   :  { %3784 = vadd.xlane.f32.xlu0 %v3783_v34 }
 0x796   :  { %4334 = vrot.lane.b32.xlu1 %v7393_v29, %s7273_s13 }
 0x79a   :  { %4547 = vrot.lane.b32.xlu1 %v7403_v33, %s7274_s18 }
 0x79e   :  { %4625 = vrot.lane.b32.xlu1 %v7411_v36, %s7274_s18 }
 0x79f   :  { %4258 = vrot.lane.b32.xlu0 %v7397_v31, %s7273_s13 }
 0x7a2   :  { %4703 = vrot.lane.b32.xlu1 %v7420_v39, %s7274_s18 }
 0x7a3   :  { %4549 = vrot.lane.b32.xlu0 %v7376_v18, %s7275_s1 }
 0x7a6   :  { %4781 = vrot.lane.b32.xlu1 %v7430_v41, %s7274_s18 }
 0x7a7   :  { %4627 = vrot.lane.b32.xlu0 %v7379_v21, %s7275_s1 }
 0x7aa   :  { %4939 = vrot.lane.b32.xlu1 %v7389_v27, %s7275_s1 }
 0x7ab   :  { %4705 = vrot.lane.b32.xlu0 %v7381_v22, %s7275_s1 }
 0x7ae   :  { %4937 = vrot.lane.b32.xlu1 %v7456_v46, %s7274_s18 }
 0x7af   :  { %4783 = vrot.lane.b32.xlu0 %v7383_v23, %s7275_s1 }
 0x7b0   :  { %v2296_v33 = vpop.f32.mrb[30].mxu1 }
 0x7b1   :  { %v6752_v36 = vpop.f32.mrb[31].mxu1  ;;  %6790 = vmatprep.mubr.msk.f32.mxu1 %vm194_vm2, %v2296_v33 }
 0x7b2   :  { %5095 = vrot.lane.b32.xlu1 %v7393_v29, %s7275_s1  ;;  %6791 = vmatmul.mubr.msk.f32.vlgmr.msra.gmra.mrb[38].mxu1 %vm194_vm2, %v7801_v24 }
 0x7b3   :  { %4861 = vrot.lane.b32.xlu0 %v7387_v26, %s7275_s1  ;;  %6803 = vmatpush3.msra.mxu1 %v7869_v16 }
 0x7b4   :  { %v2448_v39 = vpop.f32.mrb[32].mxu1  ;;  %6856 = vmatprep.subr.mxu1 %v7264_v14 }
 0x7b5   :  { %v6762_v41 = vpop.f32.mrb[33].mxu1  ;;  %6793 = vmatprep.mubr.msk.f32.mxu1 %vm194_vm2, %v2448_v39 }
 0x7b6   :  { %5093 = vrot.lane.b32.xlu1 %v7434_v42, %s7274_s18  ;;  %6794 = vmatmul.mubr.msk.f32.gmra.mrb[40].mxu1 %vm194_vm2, %v7803_v57  ;;  %v3803_v42 = vpop.permute.xlu1 %3802 }
 0x7b7   :  { %4859 = vrot.lane.b32.xlu0 %v7445_v44, %s7274_s18 }
 0x7b8   :  { %v2600_v46 = vpop.f32.mrb[34].mxu1 }
 0x7b9   :  { %v6772_v24 = vpop.f32.mrb[35].mxu1  ;;  %6796 = vmatprep.mubr.msk.f32.mxu1 %vm194_vm2, %v2600_v46 }
 0x7ba   :  { %6797 = vmatmul.mubr.msk.f32.gmra.mrb[42].mxu1 %vm194_vm2, %v7805_v61  ;;  %v3955_v44 = vpop.permute.xlu1 %3954 }
 0x7bb   :  { %5017 = vrot.lane.b32.xlu0 %v7397_v31, %s7275_s1 }
 0x7bc   :  { %v2752_v16 = vpop.f32.mrb[36].mxu1 }
 0x7bd   :  { %v6782_v35 = vpop.f32.mrb[37].mxu1  ;;  %6799 = vmatprep.mubr.msk.f32.mxu1 %vm194_vm2, %v2752_v16 }
 0x7be   :  { %6800 = vmatmul.mubr.msk.f32.gmra.mrb[44].mxu1 %vm194_vm2, %v7807_v0 }
 0x7bf   :  { %5015 = vrot.lane.b32.xlu0 %v7465_v47, %s7274_s18  ;;  %6804 = vmatprep.mubr.msk.f32.mxu1 %vm194_vm2, %v7673_v62  ;;  %v4031_v47 = vpop.permute.xlu1 %4030  ;;  %v4107_v62 = vpop.permute.xlu0 %4106 }
 0x7c2   :  { %6805 = vmatmul.mubr.msk.f32.vlgmr.msra.gmra.mrb[38].mxu1 %vm194_vm2, %v7592_v37 }
 0x7c3   :  { %6857 = vmatpush3.msra.mxu1 %v3803_v42  ;;  %6807 = vmatprep.mubr.msk.f32.mxu1 %vm194_vm2, %v7684_v4  ;;  %v4183_v37 = vpop.permute.xlu1 %4182 }
 0x7c4   :  { %6866 = vmatprep.subr.mxu1 %v7264_v14 }
 0x7c6   :  { %6808 = vmatmul.mubr.msk.f32.gmra.mrb[40].mxu1 %vm194_vm2, %v7596_v38 }
 0x7c7   :  { %6810 = vmatprep.mubr.msk.f32.mxu1 %vm194_vm2, %v7691_v8 }
 0x7ca   :  { %6811 = vmatmul.mubr.msk.f32.gmra.mrb[42].mxu1 %vm194_vm2, %v7602_v52 }
 0x7cb   :  { %6813 = vmatprep.mubr.msk.f32.mxu1 %vm194_vm2, %v7699_v10 }
 0x7ce   :  { %6814 = vmatmul.mubr.msk.f32.gmra.mrb[44].mxu1 %vm194_vm2, %v7604_v56 }
 0x7cf   :  { %6858 = vmatprep.mubr.msk.f32.mxu1 %vm7265_vm1, %v7264_v14 }
 0x7fa   :  { %v3764_v38 = vpop.xlane.xlu1 %3763 }
 0x7fb   :  { %7158 = vrcp.f32 %v3764_v38 }
 0x7fe   :  { %v3767_v4 = vpop.xlane.xlu0 %3766 }
 0x7ff   :  { %7160 = vrcp.f32 %v3767_v4 }
 0x802   :  { %v3770_v8 = vpop.xlane.xlu1 %3769 }
 0x803   :  { %7162 = vrcp.f32 %v3770_v8 }
 0x805   :  { %v7159_v52 = vpop.eup %7158 }
 0x806   :  { %v3794_v57 = vmul.f32 %v7159_v52, %v7876_v45  ;;  %v3773_v10 = vpop.xlane.xlu0 %3772 }
 0x807   :  { %7164 = vrcp.f32 %v3773_v10 }
 0x808   :  { %6859 = vmatmul.mubr.msk.f32.vlgmr.msra.gmra.mrb[46].mxu1 %vm194_vm2, %v3794_v57 }
 0x809   :  { %v7161_v56 = vpop.eup %7160  ;;  %6867 = vmatpush3.msra.mxu1 %v3955_v44  ;;  %6868 = vmatprep.mubr.msk.f32.mxu1 %vm7265_vm1, %v7264_v14 }
 0x80a   :  { %v3795_v61 = vmul.f32 %v7161_v56, %v7881_v49  ;;  %v3776_v0 = vpop.xlane.xlu1 %3775  ;;  %6876 = vmatprep.subr.mxu1 %v7264_v14 }
 0x80b   :  { %7166 = vrcp.f32 %v3776_v0 }
 0x80c   :  { %6864 = vmatmul.mubr.msk.f32.vlgmr.msra.gmra.mrb[50].mxu0 %vm194_vm2, %v3795_v61 }
 0x80d   :  { %v7163_v1 = vpop.eup %7162  ;;  %6872 = vmatpush3.msra.mxu0 %v4031_v47  ;;  %6873 = vmatprep.mubr.msk.f32.mxu0 %vm7265_vm1, %v7264_v14 }
 0x80e   :  { %v3796_v40 = vmul.f32 %v7163_v1, %v7886_v63  ;;  %v3779_v15 = vpop.xlane.xlu0 %3778  ;;  %6881 = vmatprep.subr.mxu0 %v7264_v14 }
 0x80f   :  { %7168 = vrcp.f32 %v3779_v15 }
 0x810   :  { %6869 = vmatmul.mubr.msk.f32.vlgmr.msra.gmra.mrb[48].mxu1 %vm194_vm2, %v3796_v40 }
 0x811   :  { %v7165_v45 = vpop.eup %7164  ;;  %6877 = vmatpush3.msra.mxu1 %v4107_v62  ;;  %6878 = vmatprep.mubr.msk.f32.mxu1 %vm7265_vm1, %v7264_v14 }
 0x812   :  { %v3797_v50 = vmul.f32 %v7165_v45, %v7890_v6  ;;  %v3782_v51 = vpop.xlane.xlu1 %3781  ;;  %6886 = vmatprep.subr.mxu1 %v7264_v14 }
 0x813   :  { %7170 = vrcp.f32 %v3782_v51 }
 0x814   :  { %6874 = vmatmul.mubr.msk.f32.vlgmr.msra.gmra.mrb[52].mxu0 %vm194_vm2, %v3797_v50 }
 0x815   :  { %v7167_v59 = vpop.eup %7166  ;;  %6882 = vmatpush3.msra.mxu0 %v4183_v37  ;;  %6883 = vmatprep.mubr.msk.f32.mxu0 %vm7265_vm1, %v7264_v14 }
 0x816   :  { %v3798_v9 = vmul.f32 %v7167_v59, %v7894_v54  ;;  %v4335_v49 = vpop.permute.xlu1 %4334  ;;  %v3785_v55 = vpop.xlane.xlu0 %3784  ;;  %6891 = vmatprep.subr.mxu0 %v7264_v14 }
 0x817   :  { %7172 = vrcp.f32 %v3785_v55 }
 0x818   :  { %6879 = vmatmul.mubr.msk.f32.vlgmr.msra.gmra.mrb[50].mxu1 %vm194_vm2, %v3798_v9 }
 0x819   :  { %v7169_v17 = vpop.eup %7168  ;;  %6888 = vmatprep.mubr.msk.f32.mxu1 %vm7265_vm1, %v7264_v14 }
 0x81a   :  { %v3799_v53 = vmul.f32 %v7169_v17, %v7899_v3  ;;  %v4548_v63 = vpop.permute.xlu1 %4547  ;;  %v4259_v28 = vpop.permute.xlu0 %4258 }
 0x81b   :  { %6887 = vmatpush3.msra.mxu1 %v4259_v28 }
 0x81c   :  { %6884 = vmatmul.mubr.msk.f32.vlgmr.msra.gmra.mrb[54].mxu0 %vm194_vm2, %v3799_v53  ;;  %6896 = vmatprep.subr.mxu1 %v40_v58 }
 0x81d   :  { %v7171_v2 = vpop.eup %7170  ;;  %6892 = vmatpush3.msra.mxu0 %v4335_v49  ;;  %6893 = vmatprep.mubr.msk.f32.mxu0 %vm7265_vm1, %v7264_v14 }
 0x81e   :  { %v3800_v5 = vmul.f32 %v7171_v2, %v7903_v12  ;;  %v4626_v43 = vpop.permute.xlu1 %4625  ;;  %v4550_v6 = vpop.permute.xlu0 %4549  ;;  %6910 = vmatprep.subr.mxu0 %v7264_v14 }
 0x820   :  { %6889 = vmatmul.mubr.msk.f32.vlgmr.msra.gmra.mrb[52].mxu1 %vm194_vm2, %v3800_v5 }
 0x821   :  { %v7173_v7 = vpop.eup %7172  ;;  %6897 = vmatpush3.msra.mxu1 %v40_v58 }
 0x822   :  { %v3801_v11 = vmul.f32 %v7173_v7, %v7907_v32  ;;  %v4704_v13 = vpop.permute.xlu1 %4703  ;;  %6930 = vmatprep.subr.mxu1 %v7264_v14  ;;  %v4628_v19 = vpop.permute.xlu0 %4627 }
 0x824   :  { %6894 = vmatmul.mubr.msk.f32.vlgmr.msra.gmra.mrb[56].mxu0 %vm194_vm2, %v3801_v11 }
 0x825   :  { %6911 = vmatpush3.xpose.msk.msra.mxu0 %vm194_vm2, %v4550_v6  ;;  %6912 = vmatprep.mubr.msk.f32.mxu0 %vm7265_vm1, %v7264_v14 }
 0x826   :  { %v4782_v54 = vpop.permute.xlu1 %4781  ;;  %6915 = vmatprep.subr.mxu0 %v7264_v14  ;;  %v4706_v20 = vpop.permute.xlu0 %4705 }
 0x828   :  { %6913 = vmatmul.mubr.msk.f32.vlgmr.msra.gmra.mrb[58].mxu0 %vm194_vm2, %v4548_v63 }
 0x829   :  { %6916 = vmatpush3.xpose.msk.msra.mxu0 %vm194_vm2, %v4628_v19  ;;  %6917 = vmatprep.mubr.msk.f32.mxu0 %vm7265_vm1, %v7264_v14 }
 0x82a   :  { %v4940_v48 = vpop.permute.xlu1 %4939  ;;  %6920 = vmatprep.subr.mxu0 %v7264_v14  ;;  %v4784_v3 = vpop.permute.xlu0 %4783 }
 0x82c   :  { %6918 = vmatmul.mubr.msk.f32.vlgmr.msra.gmra.mrb[60].mxu0 %vm194_vm2, %v4626_v43 }
 0x82d   :  { %6921 = vmatpush3.xpose.msk.msra.mxu0 %vm194_vm2, %v4706_v20  ;;  %6922 = vmatprep.mubr.msk.f32.mxu0 %vm7265_vm1, %v7264_v14 }
 0x82e   :  { %6925 = vmatprep.subr.mxu0 %v7264_v14  ;;  %v4938_v25 = vpop.permute.xlu1 %4937  ;;  %v4862_v33 = vpop.permute.xlu0 %4861 }
 0x830   :  { %6923 = vmatmul.mubr.msk.f32.vlgmr.msra.gmra.mrb[62].mxu0 %vm194_vm2, %v4704_v13 }
 0x831   :  { %6926 = vmatpush3.xpose.msk.msra.mxu0 %vm194_vm2, %v4784_v3  ;;  %6927 = vmatprep.mubr.msk.f32.mxu0 %vm7265_vm1, %v7264_v14 }
 0x832   :  { %6935 = vmatprep.subr.mxu0 %v7264_v14  ;;  %v5096_v60 = vpop.permute.xlu1 %5095  ;;  %v4860_v47 = vpop.permute.xlu0 %4859 }
 0x834   :  { %6928 = vmatmul.mubr.msk.f32.vlgmr.msra.gmra.mrb[64].mxu0 %vm194_vm2, %v4782_v54 }
 0x835   :  { %6936 = vmatpush3.xpose.msk.msra.mxu0 %vm194_vm2, %v4940_v48  ;;  %6937 = vmatprep.mubr.msk.f32.mxu0 %vm7265_vm1, %v7264_v14 }
 0x836   :  { %6945 = vmatprep.subr.mxu0 %v7264_v14  ;;  %v5094_v12 = vpop.permute.xlu1 %5093  ;;  %v5018_v8 = vpop.permute.xlu0 %5017 }
 0x838   :  { %6938 = vmatmul.mubr.msk.f32.vlgmr.msra.gmra.mrb[66].mxu0 %vm194_vm2, %v4938_v25 }
 0x839   :  { %6946 = vmatpush3.xpose.msk.msra.mxu0 %vm194_vm2, %v5096_v60  ;;  %6947 = vmatprep.mubr.msk.f32.mxu0 %vm7265_vm1, %v7264_v14 }
 0x83a   :  { %6955 = vmatprep.subr.mxu0 %v7264_v14  ;;  %v5016_v56 = vpop.permute.xlu0 %5015 }
 0x83c   :  { %6948 = vmatmul.mubr.msk.f32.vlgmr.msra.gmra.mrb[68].mxu0 %vm194_vm2, %v5094_v12 }
 0x83d   :  { %6957 = vmatprep.mubr.msk.f32.mxu0 %vm7265_vm1, %v7264_v14 }
 0x8db   :  { %v3874_v30 = vpop.f32.mrb[46].mxu1 }
 0x8dc   :  { %v6860_v32 = vpop.f32.mrb[47].mxu1  ;;  %6898 = vmatprep.mubr.msk.f32.mxu1 %vm194_vm2, %v3874_v30 }
 0x8df   :  { %v3950_v34 = vpop.f32.mrb[50].mxu0 }
 0x8e0   :  { %v6865_v36 = vpop.f32.mrb[51].mxu0  ;;  %6899 = vmatmul.mubr.msk.f32.vlgmr.msra.gmra.mrb[38].mxu1 %vm194_vm2, %v3950_v34 }
 0x8e1   :  { %6931 = vmatpush3.xpose.msk.msra.mxu1 %vm194_vm2, %v4862_v33 }
 0x8e2   :  { %6940 = vmatprep.subr.mxu1 %v7264_v14 }
 0x8e3   :  { %v4026_v39 = vpop.f32.mrb[48].mxu1 }
 0x8e4   :  { %v6870_v41 = vpop.f32.mrb[49].mxu1  ;;  %6901 = vmatprep.mubr.msk.f32.mxu1 %vm194_vm2, %v4026_v39 }
 0x8e7   :  { %v4102_v46 = vpop.f32.mrb[52].mxu0 }
 0x8e8   :  { %v6875_v24 = vpop.f32.mrb[53].mxu0  ;;  %6902 = vmatmul.mubr.msk.f32.gmra.mrb[40].mxu1 %vm194_vm2, %v4102_v46 }
 0x8eb   :  { %v4178_v16 = vpop.f32.mrb[50].mxu1 }
 0x8ec   :  { %v6880_v35 = vpop.f32.mrb[51].mxu1  ;;  %6904 = vmatprep.mubr.msk.f32.mxu1 %vm194_vm2, %v4178_v16 }
 0x8ef   :  { %v4254_v42 = vpop.f32.mrb[54].mxu0 }
 0x8f0   :  { %v6885_v44 = vpop.f32.mrb[55].mxu0  ;;  %6905 = vmatmul.mubr.msk.f32.gmra.mrb[42].mxu1 %vm194_vm2, %v4254_v42 }
 0x8f3   :  { %v4330_v37 = vpop.f32.mrb[52].mxu1 }
 0x8f4   :  { %v6890_v62 = vpop.f32.mrb[53].mxu1  ;;  %6907 = vmatprep.mubr.msk.f32.mxu1 %vm194_vm2, %v4330_v37 }
 0x8f7   :  { %v4406_v38 = vpop.f32.mrb[56].mxu0 }
 0x8f8   :  { %v6895_v4 = vpop.f32.mrb[57].mxu0  ;;  %6908 = vmatmul.mubr.msk.f32.gmra.mrb[44].mxu1 %vm194_vm2, %v4406_v38 }
 0x8f9   :  { %6932 = vmatprep.mubr.msk.f32.mxu1 %vm7265_vm1, %v7264_v14 }
 0x8fb   :  { %v8053_v52 = vpop.f32.mrb[58].mxu0 }
 0x8fc   :  { %v6914_v57 = vpop.f32.mrb[59].mxu0  ;;  %6933 = vmatmul.mubr.msk.f32.vlgmr.msra.gmra.mrb[54].mxu1 %vm194_vm2, %v4860_v47  ;;  %v5171_v10 = vsel %vm194_vm2, %v8053_v52, -inf }
 0x8fd   :  { %6941 = vmatpush3.xpose.msk.msra.mxu1 %vm194_vm2, %v5018_v8  ;;  %5172 = vmax.xlane.f32.xlu0 %v5171_v10 }
 0x8fe   :  { %6942 = vmatprep.mubr.msk.f32.mxu1 %vm7265_vm1, %v7264_v14  ;;  %6950 = vmatprep.subr.mxu1 %v7264_v14 }
 0x8ff   :  { %v4699_v61 = vpop.f32.mrb[60].mxu0 }
 0x900   :  { %v6919_v0 = vpop.f32.mrb[61].mxu0  ;;  %6943 = vmatmul.mubr.msk.f32.vlgmr.msra.gmra.mrb[56].mxu1 %vm194_vm2, %v5016_v56  ;;  %v5174_v1 = vsel %vm194_vm2, %v4699_v61, -inf }
 0x901   :  { %5175 = vmax.xlane.f32.xlu1 %v5174_v1  ;;  %6952 = vmatprep.mubr.msk.f32.mxu1 %vm7265_vm1, %v7264_v14 }
 0x903   :  { %v4777_v40 = vpop.f32.mrb[62].mxu0 }
 0x904   :  { %v6924_v15 = vpop.f32.mrb[63].mxu0  ;;  %v5177_v45 = vsel %vm194_vm2, %v4777_v40, -inf }
 0x905   :  { %5178 = vmax.xlane.f32.xlu0 %v5177_v45 }
 0x907   :  { %v4855_v50 = vpop.f32.mrb[64].mxu0 }
 0x908   :  { %v6929_v51 = vpop.f32.mrb[65].mxu0  ;;  %v5180_v59 = vsel %vm194_vm2, %v4855_v50, -inf }
 0x909   :  { %5181 = vmax.xlane.f32.xlu0 %v5180_v59 }
 0x90b   :  { %v5011_v9 = vpop.f32.mrb[66].mxu0 }
 0x90c   :  { %v6939_v49 = vpop.f32.mrb[67].mxu0  ;;  %v5186_v55 = vsel %vm194_vm2, %v5011_v9, -inf }
 0x90d   :  { %5187 = vmax.xlane.f32.xlu0 %v5186_v55 }
 0x90f   :  { %v5167_v17 = vpop.f32.mrb[68].mxu0 }
 0x910   :  { %v6949_v58 = vpop.f32.mrb[69].mxu0  ;;  %v5192_v53 = vsel %vm194_vm2, %v5167_v17, -inf }
 0x911   :  { %5193 = vmax.xlane.f32.xlu0 %v5192_v53 }
 0x98a   :  { %v5173_v63 = vpop.xlane.xlu0 %5172 }
 0x98b   :  { %v5195_v39 = vsub.f32 %v8053_v52, %v5173_v63 }
 0x98d   :  { %v5203_v41 = vmul.f32 1.442695, %v5195_v39 }
 0x98e   :  { %v5176_v28 = vpop.xlane.xlu1 %5175 }
 0x98f   :  { %v5196_v2 = vsub.f32 %v4699_v61, %v5176_v28 }
 0x991   :  { %v5205_v5 = vmul.f32 1.442695, %v5196_v2 }
 0x992   :  { %v5179_v43 = vpop.xlane.xlu0 %5178 }
 0x993   :  { %7174 = vpow2.f32 %v5205_v5  ;;  %v5197_v46 = vsub.f32 %v4777_v40, %v5179_v43 }
 0x995   :  { %v5207_v24 = vmul.f32 1.442695, %v5197_v46 }
 0x996   :  { %v5182_v6 = vpop.xlane.xlu0 %5181 }
 0x997   :  { %v5198_v7 = vsub.f32 %v4855_v50, %v5182_v6 }
 0x999   :  { %v5209_v11 = vmul.f32 1.442695, %v5198_v7 }
 0x99a   :  { %v5188_v13 = vpop.xlane.xlu0 %5187 }
 0x99b   :  { %7176 = vpow2.f32 %v5209_v11  ;;  %v5200_v19 = vsub.f32 %v5011_v9, %v5188_v13 }
 0x99d   :  { %v7175_v54 = vpop.eup %7174  ;;  %v5213_v20 = vmul.f32 1.442695, %v5200_v19 }
 0x99e   :  { %v5194_v48 = vpop.xlane.xlu0 %5193  ;;  %v5222_v25 = vsel %vm194_vm2, %v7175_v54, 0.0 }
 0x99f   :  { %7178 = vpow2.f32 %v5213_v20  ;;  %v5202_v3 = vsub.f32 %v5167_v17, %v5194_v48  ;;  %5223 = vadd.xlane.f32.xlu0 %v5222_v25  ;;  %v41_v25 = vld [vmem:[%s8231_s3 + $0x18] sm:$0xff] }
 0x9a1   :  { %v5217_v60 = vmul.f32 1.442695, %v5202_v3 }
 0x9a3   :  { %7180 = vpow2.f32 %v5217_v60 }
 0x9a4   :  { %7182 = vpow2.f32 %v5203_v41 }
 0x9a5   :  { %v8071_v12 = vpop.eup %7176  ;;  %7184 = vpow2.f32 %v5207_v24  ;;  %v6019_v24 = vld [vmem:[%s8233_s5] sm:$0xff] }
 0x9a6   :  { %v5228_v30 = vsel %vm194_vm2, %v8071_v12, 0.0 }
 0x9a7   :  { %5229 = vadd.xlane.f32.xlu0 %v5228_v30 }
 0x9a9   :  { %v8075_v32 = vpop.eup %7178 }
 0x9aa   :  { %v5234_v34 = vsel %vm194_vm2, %v8075_v32, 0.0 }
 0x9ab   :  { %5235 = vadd.xlane.f32.xlu0 %v5234_v34 }
 0x9ad   :  { %v8079_v33 = vpop.eup %7180 }
 0x9ae   :  { %v5240_v36 = vsel %vm194_vm2, %v8079_v33, 0.0  ;;  %v7183_v37 = vpop.eup %7182 }
 0x9af   :  { %5241 = vadd.xlane.f32.xlu0 %v5240_v36  ;;  %v5219_v62 = vsel %vm194_vm2, %v7183_v37, 0.0 }
 0x9c5   :  { %5335 = vrot.lane.b32.xlu0 %v7379_v21, %s7276_s21 }
 0x9c9   :  { %5563 = vrot.lane.b32.xlu0 %v7387_v26, %s7276_s21  ;;  %v7185_v26 = vpop.eup %7184 }
 0x9ca   :  { %v5225_v38 = vsel %vm194_vm2, %v7185_v26, 0.0 }
 0x9cd   :  { %5715 = vrot.lane.b32.xlu0 %v7397_v31, %s7276_s21 }
 0x9cf   :  { %v4933_v16 = vpop.f32.mrb[54].mxu1 }
 0x9d0   :  { %v6934_v35 = vpop.f32.mrb[55].mxu1  ;;  %v5183_v42 = vsel %vm194_vm2, %v4933_v16, -inf }
 0x9d1   :  { %5184 = vmax.xlane.f32.xlu1 %v5183_v42  ;;  %v6021_v42 = vld [vmem:[%s8233_s5 + $0x10] sm:$0xff] }
 0x9d3   :  { %v5089_v44 = vpop.f32.mrb[56].mxu1 }
 0x9d4   :  { %v6944_v47 = vpop.f32.mrb[57].mxu1  ;;  %v5189_v21 = vsel %vm194_vm2, %v5089_v44, -inf }
 0x9d5   :  { %5190 = vmax.xlane.f32.xlu1 %v5189_v21 }
 0x9d9   :  { %5220 = vadd.xlane.f32.xlu1 %v5219_v62 }
 0x9dd   :  { %5226 = vadd.xlane.f32.xlu1 %v5225_v38 }
 0x9ee   :  { %5259 = vrot.lane.b32.xlu1 %v7376_v18, %s7276_s21 }
 0x9f2   :  { %5411 = vrot.lane.b32.xlu1 %v7381_v22, %s7276_s21 }
 0x9f6   :  { %5487 = vrot.lane.b32.xlu1 %v7383_v23, %s7276_s21 }
 0x9fa   :  { %5639 = vrot.lane.b32.xlu1 %v7389_v27, %s7276_s21 }
 0xa2c   :  { %v5224_v31 = vpop.xlane.xlu0 %5223 }
 0xa2d   :  { %7186 = vrcp.f32 %v5224_v31 }
 0xa34   :  { %v5230_v4 = vpop.xlane.xlu0 %5229 }
 0xa37   :  { %v7187_v57 = vpop.eup %7186 }
 0xa38   :  { %v5236_v8 = vpop.xlane.xlu0 %5235  ;;  %v5252_v10 = vmul.f32 %v7187_v57, %v7175_v54 }
 0xa3c   :  { %v5242_v52 = vpop.xlane.xlu0 %5241 }
 0xa40   :  { %v5336_v56 = vpop.permute.xlu0 %5335 }
 0xa41   :  { %6956 = vmatpush3.msra.mxu0 %v5336_v56 }
 0xa42   :  { %6958 = vmatmul.mubr.msk.f32.vlgmr.msra.gmra.mrb[70].mxu0 %vm194_vm2, %v5252_v10  ;;  %6965 = vmatprep.subr.mxu0 %v7264_v14 }
 0xa43   :  { %6967 = vmatprep.mubr.msk.f32.mxu0 %vm7265_vm1, %v7264_v14 }
 0xa44   :  { %v5564_v5 = vpop.permute.xlu0 %5563 }
 0xa48   :  { %v5716_v3 = vpop.permute.xlu0 %5715 }
 0xa5e   :  { %v5185_v18 = vpop.xlane.xlu1 %5184 }
 0xa5f   :  { %v5199_v22 = vsub.f32 %v4933_v16, %v5185_v18  ;;  %v6020_v16 = vld [vmem:[%s8233_s5 + $0x8] sm:$0xff] }
 0xa60   :  { %v7032_v35 = vpack.c.bf16 %v6020_v16, %v6019_v24 }
 0xa61   :  { %v5211_v23 = vmul.f32 1.442695, %v5199_v22 }
 0xa62   :  { %v5191_v27 = vpop.xlane.xlu1 %5190 }
 0xa63   :  { %7188 = vpow2.f32 %v5211_v23  ;;  %v5201_v61 = vsub.f32 %v5089_v44, %v5191_v27  ;;  %v6022_v44 = vld [vmem:[%s8233_s5 + $0x18] sm:$0xff] }
 0xa64   :  { %v7036_v47 = vpack.c.bf16 %v6022_v44, %v6021_v42 }
 0xa65   :  { %v5215_v0 = vmul.f32 1.442695, %v5201_v61 }
 0xa66   :  { %v5221_v1 = vpop.xlane.xlu1 %5220 }
 0xa67   :  { %7190 = vpow2.f32 %v5215_v0 }
 0xa68   :  { %7192 = vrcp.f32 %v5221_v1 }
 0xa69   :  { %7194 = vrcp.f32 %v5230_v4  ;;  %v6409_v4 = vld [vmem:[%s8232_s4] ss:$0 sm:$0xff] }
 0xa6a   :  { %v5227_v40 = vpop.xlane.xlu1 %5226 }
 0xa6b   :  { %7196 = vrcp.f32 %v5227_v40 }
 0xa6c   :  { %7198 = vrcp.f32 %v5236_v8 }
 0xa6d   :  { %v7189_v15 = vpop.eup %7188  ;;  %7200 = vrcp.f32 %v5242_v52 }
 0xa6e   :  { %v5260_v45 = vpop.permute.xlu1 %5259  ;;  %v5231_v50 = vsel %vm194_vm2, %v7189_v15, 0.0 }
 0xa6f   :  { %5232 = vadd.xlane.f32.xlu1 %v5231_v50  ;;  %6951 = vmatpush3.msra.mxu1 %v5260_v45 }
 0xa70   :  { %6960 = vmatprep.subr.mxu1 %v7264_v14 }
 0xa71   :  { %v7191_v51 = vpop.eup %7190 }
 0xa72   :  { %v7193_v59 = vpop.eup %7192  ;;  %v5412_v9 = vpop.permute.xlu1 %5411  ;;  %v5237_v49 = vsel %vm194_vm2, %v7191_v51, 0.0 }
 0xa73   :  { %v7195_v55 = vpop.eup %7194  ;;  %v5251_v17 = vmul.f32 %v7193_v59, %v7183_v37  ;;  %5238 = vadd.xlane.f32.xlu1 %v5237_v49 }
 0xa74   :  { %v5254_v53 = vmul.f32 %v7195_v55, %v8071_v12 }
 0xa75   :  { %v7197_v58 = vpop.eup %7196  ;;  %6953 = vmatmul.mubr.msk.f32.vlgmr.msra.gmra.mrb[58].mxu1 %vm194_vm2, %v5251_v17 }
 0xa76   :  { %v5253_v63 = vmul.f32 %v7197_v58, %v7185_v26  ;;  %6961 = vmatpush3.msra.mxu1 %v5412_v9  ;;  %v5488_v28 = vpop.permute.xlu1 %5487  ;;  %6962 = vmatprep.mubr.msk.f32.mxu1 %vm7265_vm1, %v7264_v14  ;;  %v7199_v2 = vpop.eup %7198 }
 0xa77   :  { %6966 = vmatpush3.msra.mxu0 %v5488_v28  ;;  %6970 = vmatprep.subr.mxu1 %v7264_v14  ;;  %v5256_v43 = vmul.f32 %v7199_v2, %v8075_v32  ;;  %v7201_v13 = vpop.eup %7200  ;;  %v6419_v28 = vld [vmem:[%s8235_s7] ss:$0 sm:$0xff] }
 0xa78   :  { %6968 = vmatmul.mubr.msk.f32.vlgmr.msra.gmra.mrb[72].mxu0 %vm194_vm2, %v5254_v53  ;;  %6975 = vmatprep.subr.mxu0 %v7264_v14  ;;  %v5258_v19 = vmul.f32 %v7201_v13, %v8079_v33 }
 0xa79   :  { %6963 = vmatmul.mubr.msk.f32.vlgmr.msra.gmra.mrb[60].mxu1 %vm194_vm2, %v5253_v63  ;;  %6977 = vmatprep.mubr.msk.f32.mxu0 %vm7265_vm1, %v7264_v14 }
 0xa7a   :  { %6971 = vmatpush3.msra.mxu1 %v5564_v5  ;;  %v5640_v6 = vpop.permute.xlu1 %5639  ;;  %6972 = vmatprep.mubr.msk.f32.mxu1 %vm7265_vm1, %v7264_v14 }
 0xa7b   :  { %6976 = vmatpush3.msra.mxu0 %v5640_v6  ;;  %6980 = vmatprep.subr.mxu1 %v7264_v14 }
 0xa7c   :  { %6978 = vmatmul.mubr.msk.f32.vlgmr.msra.gmra.mrb[74].mxu0 %vm194_vm2, %v5256_v43  ;;  %6985 = vmatprep.subr.mxu0 %v7264_v14 }
 0xa7d   :  { %6987 = vmatprep.mubr.msk.f32.mxu0 %vm7265_vm1, %v7264_v14 }
 0xa84   :  { %5791 = vrot.lane.b32.xlu1 %v7393_v29, %s7276_s21 }
 0xafc   :  { %v5233_v7 = vpop.xlane.xlu1 %5232 }
 0xafd   :  { %7202 = vrcp.f32 %v5233_v7 }
 0xb00   :  { %v5239_v11 = vpop.xlane.xlu1 %5238 }
 0xb01   :  { %7204 = vrcp.f32 %v5239_v11 }
 0xb04   :  { %v5792_v54 = vpop.permute.xlu1 %5791 }
 0xb05   :  { %6986 = vmatpush3.msra.mxu0 %v5792_v54 }
 0xb06   :  { %6988 = vmatmul.mubr.msk.f32.vlgmr.msra.gmra.mrb[76].mxu0 %vm194_vm2, %v5258_v19  ;;  %7033 = vmatprep.subr.bf16.mxu0 %v7032_v35 }
 0xb07   :  { %v7203_v20 = vpop.eup %7202  ;;  %7035 = vmatpush3.bf16.msra.mxu0 %v7032_v35 }
 0xb08   :  { %v5255_v48 = vmul.f32 %v7203_v20, %v7189_v15  ;;  %7037 = vmatprep.subr.bf16.mxu0 %v7036_v47 }
 0xb0a   :  { %6973 = vmatmul.mubr.msk.f32.vlgmr.msra.gmra.mrb[62].mxu1 %vm194_vm2, %v5255_v48 }
 0xb0b   :  { %v7205_v29 = vpop.eup %7204  ;;  %6981 = vmatpush3.msra.mxu1 %v5716_v3  ;;  %6982 = vmatprep.mubr.msk.f32.mxu1 %vm7265_vm1, %v7264_v14 }
 0xb0c   :  { %v5257_v60 = vmul.f32 %v7205_v29, %v7191_v51  ;;  %6990 = vmatprep.subr.mxu1 %v41_v25  ;;  %7039 = vmatpush3.bf16.msra.mxu0 %v7036_v47  ;;  %v6410_v51 = vld [vmem:[%s8234_s6] ss:$0 sm:$0xff]  ;;  %s7277_s6 = smov [#allocation2]  }
 0xb0d   :  { %s6264_s7 = sshll.u32 %s7277_s6, 4  ;;  %s6265_s7 = int_to_ptr.vmem [resolvable:$true] %s6264_s7 }
 0xb0e   :  { %6983 = vmatmul.mubr.msk.f32.vlgmr.msra.gmra.mrb[64].mxu1 %vm194_vm2, %v5257_v60  ;;  %s7240_s11 = scalar_lea.vmem %s6265_s7, 128  ;;  %p7245_p1 = scmp.lt.s32.totalorder %s6265_s7, %s6265_s7 }
 0xb0f   :  { %6991 = vmatpush3.msra.mxu1 %v41_v25  ;;  %p7241_p0 = scmp.ne.s32.totalorder %s6265_s7, %s7240_s11  ;;  %p7246_p2 = scmp.lt.s32.totalorder %s7240_s11, %s7240_s11 }
 0xb11   :  { %p7247_p3 = por %p7246_p2, %p7245_p1 }
 0xb13   :  { %p7248_p4 = pnand %p7247_p3, %p7241_p0 }
 0xb15   :  { %v5407_v12 = vpop.f32.mrb[70].mxu0 }
 0xb16   :  { %v6959_v30 = vpop.f32.mrb[71].mxu0 }
 0xb48   :  { %v5331_v32 = vpop.f32.mrb[58].mxu1 }
 0xb49   :  { %v6954_v34 = vpop.f32.mrb[59].mxu1  ;;  %6992 = vmatprep.mubr.msk.f32.mxu1 %vm194_vm2, %v5331_v32 }
 0xb4a   :  { %6993 = vmatmul.mubr.msk.f32.vlgmr.msra.gmra.mrb[38].mxu1 %vm194_vm2, %v5407_v12 }
 0xb4b   :  { %v5559_v33 = vpop.f32.mrb[72].mxu0 }
 0xb4c   :  { %v5483_v36 = vpop.f32.mrb[60].mxu1  ;;  %v6969_v39 = vpop.f32.mrb[73].mxu0 }
 0xb4d   :  { %v6964_v41 = vpop.f32.mrb[61].mxu1  ;;  %6995 = vmatprep.mubr.msk.f32.mxu1 %vm194_vm2, %v5483_v36 }
 0xb4e   :  { %6996 = vmatmul.mubr.msk.f32.gmra.mrb[40].mxu1 %vm194_vm2, %v5559_v33 }
 0xb4f   :  { %v5711_v14 = vpop.f32.mrb[74].mxu0 }
 0xb50   :  { %v6979_v46 = vpop.f32.mrb[75].mxu0 }
 0xbd9   :  { %v5863_v21 = vpop.f32.mrb[76].mxu0 }
 0xbda   :  { %v6989_v37 = vpop.f32.mrb[77].mxu0 }
 0xbdd   :  { %v5635_v62 = vpop.f32.mrb[62].mxu1 }
 0xbde   :  { %v6974_v26 = vpop.f32.mrb[63].mxu1  ;;  %6998 = vmatprep.mubr.msk.f32.mxu1 %vm194_vm2, %v5635_v62 }
 0xbdf   :  { %6999 = vmatmul.mubr.msk.f32.gmra.mrb[42].mxu1 %vm194_vm2, %v5711_v14 }
 0xbe1   :  { %v5787_v38 = vpop.f32.mrb[64].mxu1 }
 0xbe2   :  { %v6984_v31 = vpop.f32.mrb[65].mxu1  ;;  %7001 = vmatprep.mubr.msk.f32.mxu1 %vm194_vm2, %v5787_v38 }
 0xbe3   :  { %7002 = vmatmul.mubr.msk.f32.gmra.mrb[44].mxu1 %vm194_vm2, %v5863_v21 }
 0xc1d   :  { %v6994_v8 = vpop.f32.mrb[38].mxu1 }
 0xc1e   :  { %v5957_v52 = vpop.f32.mrb[39].mxu1  ;;  %v8163_v10 = vadd.f32 %v6994_v8, %v6409_v4 }
 0xc1f   :  { %v8161_v57 = vadd.f32 %v6409_v4, %v5957_v52 }
 0xc21   :  { %v6997_v56 = vpop.f32.mrb[40].mxu1  ;;  %7012 = vmatprep.mubr.msk.f32.mxu0 %vm53_vm0, %v8161_v57 }
 0xc22   :  { %v5967_v18 = vpop.f32.mrb[41].mxu1  ;;  %7013 = vmatmul.mubr.msk.f32.vlgmr.msra.gmra.mrb[78].mxu0 %vm53_vm0, %v8163_v10  ;;  %v8171_v23 = vadd.f32 %v6997_v56, %v6409_v4 }
 0xc23   :  { %v8169_v22 = vadd.f32 %v6409_v4, %v5967_v18 }
 0xc25   :  { %7015 = vmatprep.mubr.msk.f32.mxu0 %vm53_vm0, %v8169_v22 }
 0xc26   :  { %7016 = vmatmul.mubr.msk.f32.gmra.mrb[80].mxu0 %vm53_vm0, %v8171_v23 }
 0xcb2   :  { %v7000_v27 = vpop.f32.mrb[42].mxu1 }
 0xcb3   :  { %v5977_v61 = vpop.f32.mrb[43].mxu1  ;;  %v8179_v1 = vadd.f32 %v7000_v27, %v6409_v4 }
 0xcb4   :  { %v8177_v0 = vadd.f32 %v6409_v4, %v5977_v61 }
 0xcb6   :  { %v7003_v40 = vpop.f32.mrb[44].mxu1  ;;  %7018 = vmatprep.mubr.msk.f32.mxu0 %vm53_vm0, %v8177_v0 }
 0xcb7   :  { %v5987_v15 = vpop.f32.mrb[45].mxu1  ;;  %7019 = vmatmul.mubr.msk.f32.gmra.mrb[82].mxu0 %vm53_vm0, %v8179_v1  ;;  %v8187_v50 = vadd.f32 %v7003_v40, %v6409_v4 }
 0xcb8   :  { %v8185_v45 = vadd.f32 %v6409_v4, %v5987_v15 }
 0xcba   :  { %7021 = vmatprep.mubr.msk.f32.mxu0 %vm53_vm0, %v8185_v45 }
 0xcbb   :  { %7022 = vmatmul.mubr.msk.f32.gmra.mrb[84].mxu0 %vm53_vm0, %v8187_v50 }
 0xcf5   :  { %v7014_v59 = vpop.f32.mrb[78].mxu0 }
 0xcf6   :  { %v6126_v9 = vadd.f32 %v7014_v59, %v6410_v51  ;;  %v6120_v49 = vpop.f32.mrb[79].mxu0 }
 0xcf7   :  { %v6121_v55 = vadd.f32 %v6410_v51, %v6120_v49 }
 0xcf8   :  { %7206 = vtanh.f32 %v6126_v9 }
 0xcf9   :  { %7208 = vtanh.f32 %v6121_v55  ;;  %v7017_v17 = vpop.f32.mrb[80].mxu0 }
 0xcfa   :  { %v6136_v58 = vadd.f32 %v7017_v17, %v6410_v51  ;;  %v6130_v53 = vpop.f32.mrb[81].mxu0 }
 0xcfb   :  { %v6131_v63 = vadd.f32 %v6410_v51, %v6130_v53 }
 0xcfc   :  { %7210 = vtanh.f32 %v6136_v58 }
 0xcfd   :  { %7212 = vtanh.f32 %v6131_v63 }
 0xd02   :  { %v7207_v2 = vpop.eup %7206 }
 0xd03   :  { %v7209_v5 = vpop.eup %7208  ;;  %v6175_v43 = vmul.f32 %v7207_v2, %v6419_v28 }
 0xd04   :  { %v6174_v6 = vmul.f32 %v7209_v5, %v6419_v28 }
 0xd05   :  { %v6186_v7 = vsel %vm6182_vm3, %v6175_v43, 0.0 }
 0xd06   :  { %v7211_v11 = vpop.eup %7210  ;;  %6187 = vadd.xlane.f32.xlu1 %v6186_v7  ;;  %v6183_v13 = vsel %vm6182_vm3, %v6174_v6, 0.0 }
 0xd07   :  { %v7213_v19 = vpop.eup %7212  ;;  %6184 = vadd.xlane.f32.xlu0 %v6183_v13  ;;  %v6177_v48 = vmul.f32 %v7211_v11, %v6419_v28 }
 0xd08   :  { %v6176_v54 = vmul.f32 %v7213_v19, %v6419_v28 }
 0xd09   :  { %v6192_v25 = vsel %vm6182_vm3, %v6177_v48, 0.0 }
 0xd0a   :  { %v6189_v20 = vsel %vm6182_vm3, %v6176_v54, 0.0 }
 0xd0b   :  { %6190 = vadd.xlane.f32.xlu0 %v6189_v20 }
 0xd0f   :  { %6193 = vadd.xlane.f32.xlu0 %v6192_v25 }
 0xd8a   :  { %v7020_v3 = vpop.f32.mrb[82].mxu0 }
 0xd8b   :  { %v6146_v29 = vadd.f32 %v7020_v3, %v6410_v51  ;;  %v6140_v60 = vpop.f32.mrb[83].mxu0 }
 0xd8c   :  { %v6141_v12 = vadd.f32 %v6410_v51, %v6140_v60 }
 0xd8d   :  { %7214 = vtanh.f32 %v6146_v29 }
 0xd8e   :  { %7216 = vtanh.f32 %v6141_v12  ;;  %v7023_v30 = vpop.f32.mrb[84].mxu0 }
 0xd8f   :  { %v6156_v32 = vadd.f32 %v7023_v30, %v6410_v51  ;;  %v6150_v34 = vpop.f32.mrb[85].mxu0 }
 0xd90   :  { %v6151_v33 = vadd.f32 %v6410_v51, %v6150_v34 }
 0xd91   :  { %7218 = vtanh.f32 %v6156_v32 }
 0xd92   :  { %7220 = vtanh.f32 %v6151_v33 }
 0xd93   :  { %v6188_v26 = vpop.xlane.xlu1 %6187 }
 0xd94   :  { %v6185_v37 = vpop.xlane.xlu0 %6184  ;;  %v6209_v38 = vmul.f32 1.442695, %v6188_v26 }
 0xd95   :  { %v6207_v31 = vmul.f32 1.442695, %v6185_v37 }
 0xd96   :  { %7222 = vpow2.f32 %v6209_v38 }
 0xd97   :  { %v7215_v36 = vpop.eup %7214  ;;  %7224 = vpow2.f32 %v6207_v31 }
 0xd98   :  { %v7217_v39 = vpop.eup %7216  ;;  %v6179_v41 = vmul.f32 %v7215_v36, %v6419_v28  ;;  %v6191_v62 = vpop.xlane.xlu0 %6190 }
 0xd99   :  { %v6178_v14 = vmul.f32 %v7217_v39, %v6419_v28  ;;  %v6211_v8 = vmul.f32 1.442695, %v6191_v62 }
 0xd9a   :  { %v6198_v46 = vsel %vm6182_vm3, %v6179_v41, 0.0 }
 0xd9b   :  { %v7219_v24 = vpop.eup %7218  ;;  %6199 = vadd.xlane.f32.xlu0 %v6198_v46  ;;  %v6195_v16 = vsel %vm6182_vm3, %v6178_v14, 0.0  ;;  %7226 = vpow2.f32 %v6211_v8 }
 0xd9c   :  { %v7221_v35 = vpop.eup %7220  ;;  %6196 = vadd.xlane.f32.xlu1 %v6195_v16  ;;  %v6181_v42 = vmul.f32 %v7219_v24, %v6419_v28  ;;  %v6194_v4 = vpop.xlane.xlu0 %6193 }
 0xd9d   :  { %v6180_v44 = vmul.f32 %v7221_v35, %v6419_v28  ;;  %v6213_v52 = vmul.f32 1.442695, %v6194_v4 }
 0xd9e   :  { %v6204_v47 = vsel %vm6182_vm3, %v6181_v42, 0.0 }
 0xd9f   :  { %6205 = vadd.xlane.f32.xlu0 %v6204_v47  ;;  %v6201_v21 = vsel %vm6182_vm3, %v6180_v44, 0.0  ;;  %7228 = vpow2.f32 %v6213_v52 }
 0xda0   :  { %6202 = vadd.xlane.f32.xlu1 %v6201_v21  ;;  %v7223_v15 = vpop.eup %7222 }
 0xda1   :  { %v7225_v59 = vpop.eup %7224 }
 0xda2   :  { %v6224_v17 = vadd.f32 %v7225_v59, %v7223_v15 }
 0xda5   :  { %v7227_v55 = vpop.eup %7226 }
 0xda6   :  { %v6225_v53 = vadd.f32 %v7227_v55, %v6224_v17 }
 0xda9   :  { %v7229_v58 = vpop.eup %7228 }
 0xdaa   :  { %v6226_v63 = vadd.f32 %v7229_v58, %v6225_v53 }
 0xe28   :  { %v6200_v56 = vpop.xlane.xlu0 %6199 }
 0xe29   :  { %v6197_v18 = vpop.xlane.xlu1 %6196  ;;  %v6217_v27 = vmul.f32 1.442695, %v6200_v56 }
 0xe2a   :  { %v6215_v61 = vmul.f32 1.442695, %v6197_v18 }
 0xe2c   :  { %7230 = vpow2.f32 %v6215_v61  ;;  %v6206_v40 = vpop.xlane.xlu0 %6205 }
 0xe2d   :  { %v6203_v51 = vpop.xlane.xlu1 %6202  ;;  %7232 = vpow2.f32 %v6217_v27  ;;  %v6221_v9 = vmul.f32 1.442695, %v6206_v40 }
 0xe2e   :  { %v6219_v49 = vmul.f32 1.442695, %v6203_v51 }
 0xe30   :  { %7234 = vpow2.f32 %v6219_v49 }
 0xe31   :  { %7236 = vpow2.f32 %v6221_v9 }
 0xe36   :  { %v7231_v28 = vpop.eup %7230 }
 0xe37   :  { %v6227_v2 = vadd.f32 %v7231_v28, %v6226_v63  ;;  %v7233_v5 = vpop.eup %7232 }
 0xe39   :  { %v6228_v43 = vadd.f32 %v7233_v5, %v6227_v2 }
 0xe3a   :  { %v7235_v6 = vpop.eup %7234 }
 0xe3b   :  { %v6229_v7 = vadd.f32 %v7235_v6, %v6228_v43  ;;  %v7237_v11 = vpop.eup %7236 }
 0xe3d   :  { %v6230_v13 = vadd.f32 %v7237_v11, %v6229_v7 }
 0xe3f   :  { %v6231_v19 = vadd.f32 1e-08, %v6230_v13 }
 0xe41   :  { %7238 = vrcp.f32 %v6231_v19 }
 0xe4b   :  { %v7239_v54 = vpop.eup %7238 }
 0xe4c   :  { %v6233_v20 = vmul.f32 %v7239_v54, %v7225_v59  ;;  %v6236_v48 = vmul.f32 %v7239_v54, %v7223_v15  ;;  %v6239_v25 = vmul.f32 %v7239_v54, %v7227_v55  ;;  %v6242_v60 = vmul.f32 %v7239_v54, %v7229_v58 }
 0xe4d   :  { %v6245_v32 = vmul.f32 %v7239_v54, %v7231_v28  ;;  %v6248_v36 = vmul.f32 %v7239_v54, %v7233_v5  ;;  %v6251_v14 = vmul.f32 %v7239_v54, %v7235_v6  ;;  %v6254_v16 = vmul.f32 %v7239_v54, %v7237_v11 }
 0xe4e   :  { %v6234_v3 = vmul.f32 %v6233_v20, %v8161_v57  ;;  %v6237_v29 = vmul.f32 %v6236_v48, %v8163_v10  ;;  %v6240_v30 = vmul.f32 %v6239_v25, %v8169_v22  ;;  %v6243_v33 = vmul.f32 %v6242_v60, %v8171_v23 }
 0xe4f   :  { %v6246_v41 = vmul.f32 %v6245_v32, %v8177_v0  ;;  %v6249_v24 = vmul.f32 %v6248_v36, %v8179_v1  ;;  %v6252_v10 = vmul.f32 %v6251_v14, %v8185_v45  ;;  %v6255_v22 = vmul.f32 %v6254_v16, %v8187_v50 }
 0xe50   :  { %v6238_v12 = vadd.f32 %v6237_v29, %v6234_v3 }
 0xe52   :  { %v6241_v34 = vadd.f32 %v6240_v30, %v6238_v12 }
 0xe54   :  { %v6244_v39 = vadd.f32 %v6243_v33, %v6241_v34 }
 0xe56   :  { %v6247_v46 = vadd.f32 %v6246_v41, %v6244_v39 }
 0xe58   :  { %v6250_v57 = vadd.f32 %v6249_v24, %v6247_v46 }
 0xe5a   :  { %v6253_v35 = vadd.f32 %v6252_v10, %v6250_v57 }
 0xe5c   :  { %v6256_v42 = vadd.f32 %v6255_v22, %v6253_v35 }
 0xe5e   :  { %6257 = vst.msk [vmem:[#allocation2] sm:$0xff] %vm53_vm0, %v6256_v42 }
 0xe5f   :  { %7251 = shalt.err (!%p7248_p4)
}
 0xe60   :  { %s7252_s14 = scalar_lea.hbm %s8236_s8, 128 }
 0xe61   :  { %p7253_p5 = scmp.ne.s32.totalorder %s8236_s8, %s7252_s14  ;;  %p7256_p6 = scmp.lt.u32.totalorder %s7252_s14, %s8236_s8 }
 0xe63   :  { %p7258_p7 = pnand %p7256_p6, %p7253_p5 }
 0xe65   :  { %7261 = shalt.err (!%p7258_p7)
}
 0xe66   :  { %6267 = dma.vmem_to_hbm [thread:$0]  %s6265_s7, 128, %s8236_s8, [#allocation3]  }
 0xe67   :  { %7262 = dma.done.wait [#allocation3], 128  }
 0xe68   :  { %7263 = vsyncadd [#allocation3], 4294967168 }
 0xe69   :  { %6271 = vsyncpa [#allocation3], 1 }

</bundles_post_ra>
